<compile_context>
chip_gen: v5e
topology: v5e:2x2
jax: 0.10.0
libtpu: 0.0.40
codegen_flags: <defaults>
</compile_context>

<pallas_src>
import functools

import jax
import jax.numpy as jnp
from jax.experimental import pallas as pl
from jax.experimental.pallas import tpu as pltpu


def _head_kernel(feat_ref, w1_ref, b1_ref, w2_ref, b2_ref, w3_ref, b3_ref,
                 out_ref, act_ref):
    # feat_ref: (TM, HW, C) bfloat16 -> pool with f32 accumulation.
    feat = feat_ref[...].astype(jnp.float32)

    # AdaptiveAvgPool2d((1,1)) + flatten  -> mean over spatial positions.
    act = jnp.mean(feat, axis=1)                               # (TM, 1024) f32
    act_ref[...] = act.astype(act_ref.dtype)

    # fc[0]: Linear(1024, 512) — bf16 MXU matmul, f32 accumulation.
    h1 = jnp.dot(act.astype(jnp.bfloat16), w1_ref[...],
                 preferred_element_type=jnp.float32) + b1_ref[...]
    # fc[1]: Linear(512, 256)
    h2 = jnp.dot(h1.astype(jnp.bfloat16), w2_ref[...],
                 preferred_element_type=jnp.float32) + b2_ref[...]
    # fc[2]: ReLU
    h2 = jnp.maximum(h2, 0.0)
    # fc[3]: Linear(256, nc_pad)   (padded lanes carry bias -1e30 -> exp == 0)
    logits = jnp.dot(h2.astype(jnp.bfloat16), w3_ref[...],
                     preferred_element_type=jnp.float32) + b3_ref[...]
    # fc[4]: Softmax(dim=1) over the 128 padded lanes; pads contribute 0.
    m = jnp.max(logits, axis=1, keepdims=True)
    e = jnp.exp(logits - m)
    denom = jnp.sum(e, axis=1, keepdims=True)
    # Exact divide so each row sums to 1.0 within f32 rounding.
    out_ref[...] = (e / denom).astype(out_ref.dtype)


@functools.partial(jax.jit, static_argnames=("num_classes",))
def google_net_head(features_nchw, params, num_classes):
    """features_nchw: (N, 1024, Hf, Wf) — output of the GoogLeNet backbone."""
    n, c, hf, wf = features_nchw.shape
    assert c == 1024, "GoogLeNet backbone produces 1024 channels"
    hw = hf * wf

    # NCHW -> (N, HW, C): channels (1024) on the lane axis.  Streamed as bf16
    # (half the HBM bytes / VMEM footprint); pooled in f32 inside the kernel.
    feat = jnp.transpose(features_nchw, (0, 2, 3, 1)).reshape(n, hw, c)
    feat = feat.astype(jnp.bfloat16)

    w1, b1, w2, b2, w3, b3 = params  # w's (in, out); b's (1, out), all f32

    # bf16 weights: halves the dominant HBM traffic; biases stay f32 (tiny).
    w1 = w1.astype(jnp.bfloat16)
    w2 = w2.astype(jnp.bfloat16)

    # Lane-pad the last layer to a multiple of 128 output columns so the
    # output store is unmasked/lane-dense.  Pad bias with -1e30 so softmax on
    # padded lanes is exactly 0; wrapper slices the result back.
    nc_pad = max(128, pl.cdiv(num_classes, 128) * 128)
    pad_cols = nc_pad - num_classes
    w3p = jnp.pad(w3, ((0, 0), (0, pad_cols))).astype(jnp.bfloat16)
    b3p = jnp.pad(b3, ((0, 0), (0, pad_cols)), constant_values=-1e30)

    # ---- VMEM-budget-derived batch tile (portable across v5e/v6e/v7x) ----
    # Weight/bias bytes (Pallas double-buffers them even with a constant
    # index_map) + per-row bytes: feat double buffer (bf16) + f32 outputs.
    weight_bytes = 2 * (w1.size * 2 + w2.size * 2 + w3p.size * 2
                        + b1.size * 4 + b2.size * 4 + b3p.size * 4)
    per_row_bytes = 2 * hw * c * 2 + 2 * (nc_pad + c) * 4
    vmem_budget = 14 * 1024 * 1024   # fits v5e's 16 MiB default scoped VMEM
    tm_max = max(8, min(128,
                        ((vmem_budget - weight_bytes) // per_row_bytes) // 8 * 8))
    tm = n if n <= tm_max else tm_max
    n_pad = pl.cdiv(n, tm) * tm
    if n_pad != n:
        feat = jnp.pad(feat, ((0, n_pad - n), (0, 0), (0, 0)))

    # Explicit scoped-VMEM limit: actual need + ~25% headroom (>= 16 MiB so we
    # never shrink below per-generation defaults, capped at v7x's 64 MiB).
    need_bytes = weight_bytes + tm * per_row_bytes
    vmem_limit = int(min(max(need_bytes * 5 // 4 + (1 << 20), 16 * 1024 * 1024),
                         64 * 1024 * 1024))

    # Advisory cost so XLA can overlap this small DMA-bound call.
    cost = pl.CostEstimate(
        flops=2 * n_pad * (hw * c + c * 512 + 512 * 256 + 256 * nc_pad),
        transcendentals=n_pad * nc_pad,
        bytes_accessed=(feat.size * 2 + w1.size * 2 + w2.size * 2 + w3p.size * 2
                        + b1.size * 4 + b2.size * 4 + b3p.size * 4
                        + n_pad * nc_pad * 4 + n_pad * c * 4),
    )

    grid_spec = pl.GridSpec(
        grid=(n_pad // tm,),
        in_specs=[
            pl.BlockSpec((tm, hw, c), lambda i: (i, 0, 0)),
            pl.BlockSpec(w1.shape, lambda i: (0, 0)),
            pl.BlockSpec(b1.shape, lambda i: (0, 0)),
            pl.BlockSpec(w2.shape, lambda i: (0, 0)),
            pl.BlockSpec(b2.shape, lambda i: (0, 0)),
            pl.BlockSpec(w3p.shape, lambda i: (0, 0)),
            pl.BlockSpec(b3p.shape, lambda i: (0, 0)),
        ],
        out_specs=[
            pl.BlockSpec((tm, nc_pad), lambda i: (i, 0)),
            pl.BlockSpec((tm, c), lambda i: (i, 0)),
        ],
    )

    out_p, activation_p = pl.pallas_call(
        _head_kernel,
        grid_spec=grid_spec,
        out_shape=(
            jax.ShapeDtypeStruct((n_pad, nc_pad), jnp.float32),
            jax.ShapeDtypeStruct((n_pad, c), jnp.float32),
        ),
        compiler_params=pltpu.CompilerParams(
            dimension_semantics=("parallel",),
            vmem_limit_bytes=vmem_limit,
            # Let XLA fuse the NCHW->NHWC transpose/cast into the feat operand.
            allow_input_fusion=[True, False, False, False, False, False, False],
        ),
        cost_estimate=cost,
    )(feat, w1, b1, w2, b2, w3p, b3p)

    # Slice away batch padding and the lane padding of the class axis.
    return out_p[:n, :num_classes], activation_p[:n, :]


def init_fc_params(key, num_classes):
    """Deterministic init, PyTorch nn.Linear default: U(-1/sqrt(fan_in), +)."""
    dims = [(1024, 512), (512, 256), (256, num_classes)]
    params = []
    for (fan_in, fan_out) in dims:
        key, kw, kb = jax.random.split(key, 3)
        bound = 1.0 / jnp.sqrt(fan_in)
        # PyTorch stores (out, in); we pass the transpose (in, out) so the
        # kernel computes x @ W_T + b exactly as nn.Linear does.
        w = jax.random.uniform(kw, (fan_in, fan_out), jnp.float32,
                               minval=-bound, maxval=bound)
        b = jax.random.uniform(kb, (1, fan_out), jnp.float32,
                               minval=-bound, maxval=bound)
        params += [w, b]
    return tuple(params)


def _reference(features_nchw, params):
    """Pure-JAX reference mirroring the kernel's bf16 feature/weight quant."""
    w1, b1, w2, b2, w3, b3 = params
    bf = jnp.bfloat16
    feat = features_nchw.astype(bf).astype(jnp.float32)
    act = jnp.mean(feat, axis=(2, 3))                              # (N, 1024)
    h = jnp.dot(act.astype(bf), w1.astype(bf),
                preferred_element_type=jnp.float32) + b1
    h = jnp.dot(h.astype(bf), w2.astype(bf),
                preferred_element_type=jnp.float32) + b2
    h = jnp.maximum(h, 0.0)
    logits = jnp.dot(h.astype(bf), w3.astype(bf),
                     preferred_element_type=jnp.float32) + b3
    return jax.nn.softmax(logits, axis=1), act


if __name__ == "__main__":
    key = jax.random.PRNGKey(0)
    k_x, k_p = jax.random.split(key)

    num_classes = 10
    # Backbone feature map for a 128x128 input image: (N, 1024, 4, 4).
    x = jax.random.normal(k_x, (2, 1024, 4, 4), dtype=jnp.float32)
    params = init_fc_params(k_p, num_classes)

    out, activation = google_net_head(x, params, num_classes)
    out, activation = jax.block_until_ready((out, activation))

    ref_out, ref_act = _reference(x, params)
    assert out.shape == (2, num_classes) and activation.shape == (2, 1024)
    # Pooled features: bf16 inputs, f32 accumulation (reference mirrors this).
    assert jnp.allclose(activation, ref_act, atol=1e-4, rtol=1e-4)
    # Softmax output: bf16 matmuls -> slightly looser.
    assert jnp.allclose(out, ref_out, atol=2e-3, rtol=2e-3)
    # Exact divide -> rows normalize within f32 rounding.
    assert jnp.allclose(jnp.sum(out, axis=1), 1.0, atol=1e-3)

    print("KERNEL_OK")
</pallas_src>

<mosaic_0001>
module attributes {stable_mosaic.version = 11 : i64} {
  func.func @_head_kernel(%arg0: i32, %arg1: memref<2x16x1024xbf16, #tpu.memory_space<vmem>>, %arg2: memref<1024x512xbf16, #tpu.memory_space<vmem>>, %arg3: memref<1x512xf32, #tpu.memory_space<vmem>>, %arg4: memref<512x256xbf16, #tpu.memory_space<vmem>>, %arg5: memref<1x256xf32, #tpu.memory_space<vmem>>, %arg6: memref<256x128xbf16, #tpu.memory_space<vmem>>, %arg7: memref<1x128xf32, #tpu.memory_space<vmem>>, %arg8: memref<2x128xf32, #tpu.memory_space<vmem>>, %arg9: memref<2x1024xf32, #tpu.memory_space<vmem>>) attributes {dimension_semantics = [#tpu.dimension_semantics<parallel>], iteration_bounds = array<i64: 1>, scalar_prefetch = 0 : i64, scratch_operands = 0 : i64, tpu.core_type = #tpu.core_type<tc>, window_params = [{transform_indices = @transform_0, window_bounds = array<i64: 2, 16, 1024>}, {pipeline_mode = #tpu.pipeline_mode<synchronous>, transform_indices = @transform_1, window_bounds = array<i64: 1024, 512>}, {pipeline_mode = #tpu.pipeline_mode<synchronous>, transform_indices = @transform_2, window_bounds = array<i64: 1, 512>}, {pipeline_mode = #tpu.pipeline_mode<synchronous>, transform_indices = @transform_3, window_bounds = array<i64: 512, 256>}, {pipeline_mode = #tpu.pipeline_mode<synchronous>, transform_indices = @transform_4, window_bounds = array<i64: 1, 256>}, {pipeline_mode = #tpu.pipeline_mode<synchronous>, transform_indices = @transform_5, window_bounds = array<i64: 256, 128>}, {pipeline_mode = #tpu.pipeline_mode<synchronous>, transform_indices = @transform_6, window_bounds = array<i64: 1, 128>}, {transform_indices = @transform_7, window_bounds = array<i64: 2, 128>}, {transform_indices = @transform_8, window_bounds = array<i64: 2, 1024>}]} {
    %c0 = arith.constant 0 : index
    %c0_0 = arith.constant 0 : index
    %c0_1 = arith.constant 0 : index
    %0 = vector.load %arg1[%c0, %c0_0, %c0_1] : memref<2x16x1024xbf16, #tpu.memory_space<vmem>>, vector<2x16x1024xbf16>
    %1 = arith.extf %0 : vector<2x16x1024xbf16> to vector<2x16x1024xf32>
    %cst = arith.constant dense<0.000000e+00> : vector<2x1024xf32>
    %2 = vector.multi_reduction <add>, %1, %cst [1] : vector<2x16x1024xf32> to vector<2x1024xf32>
    %cst_2 = arith.constant 1.600000e+01 : f32
    %3 = vector.broadcast %cst_2 : f32 to vector<2x1024xf32>
    %4 = arith.divf %2, %3 : vector<2x1024xf32>
    %c0_3 = arith.constant 0 : index
    %c0_4 = arith.constant 0 : index
    %5 = vector.load %arg9[%c0_3, %c0_4] : memref<2x1024xf32, #tpu.memory_space<vmem>>, vector<2x1024xf32>
    tpu.vector_store %arg9[%c0_3, %c0_4], %4 {strides = array<i32>} : memref<2x1024xf32, #tpu.memory_space<vmem>>, vector<2x1024xf32>,
    %6 = arith.truncf %4 : vector<2x1024xf32> to vector<2x1024xbf16>
    %c0_5 = arith.constant 0 : index
    %c0_6 = arith.constant 0 : index
    %7 = vector.load %arg2[%c0_5, %c0_6] : memref<1024x512xbf16, #tpu.memory_space<vmem>>, vector<1024x512xbf16>
    %cst_7 = arith.constant dense<0.000000e+00> : vector<2x512xf32>
    %8 = tpu.matmul %6, %7, %cst_7 {dimension_numbers = #tpu.dot_dimension_numbers<[1], [0], [0], [1], [0, 0, 1, 1], [], []>} : vector<2x1024xbf16>, vector<1024x512xbf16>, vector<2x512xf32> -> vector<2x512xf32>
    %c0_8 = arith.constant 0 : index
    %c0_9 = arith.constant 0 : index
    %9 = vector.load %arg3[%c0_8, %c0_9] : memref<1x512xf32, #tpu.memory_space<vmem>>, vector<1x512xf32>
    %10 = vector.broadcast %9 : vector<1x512xf32> to vector<2x512xf32>
    %11 = arith.addf %8, %10 : vector<2x512xf32>
    %12 = arith.truncf %11 : vector<2x512xf32> to vector<2x512xbf16>
    %c0_10 = arith.constant 0 : index
    %c0_11 = arith.constant 0 : index
    %13 = vector.load %arg4[%c0_10, %c0_11] : memref<512x256xbf16, #tpu.memory_space<vmem>>, vector<512x256xbf16>
    %cst_12 = arith.constant dense<0.000000e+00> : vector<2x256xf32>
    %14 = tpu.matmul %12, %13, %cst_12 {dimension_numbers = #tpu.dot_dimension_numbers<[1], [0], [0], [1], [0, 0, 1, 1], [], []>} : vector<2x512xbf16>, vector<512x256xbf16>, vector<2x256xf32> -> vector<2x256xf32>
    %c0_13 = arith.constant 0 : index
    %c0_14 = arith.constant 0 : index
    %15 = vector.load %arg5[%c0_13, %c0_14] : memref<1x256xf32, #tpu.memory_space<vmem>>, vector<1x256xf32>
    %16 = vector.broadcast %15 : vector<1x256xf32> to vector<2x256xf32>
    %17 = arith.addf %14, %16 : vector<2x256xf32>
    %cst_15 = arith.constant 0.000000e+00 : f32
    %18 = vector.broadcast %cst_15 : f32 to vector<2x256xf32>
    %19 = arith.maximumf %17, %18 : vector<2x256xf32>
    %20 = arith.truncf %19 : vector<2x256xf32> to vector<2x256xbf16>
    %c0_16 = arith.constant 0 : index
    %c0_17 = arith.constant 0 : index
    %21 = vector.load %arg6[%c0_16, %c0_17] : memref<256x128xbf16, #tpu.memory_space<vmem>>, vector<256x128xbf16>
    %cst_18 = arith.constant dense<0.000000e+00> : vector<2x128xf32>
    %22 = tpu.matmul %20, %21, %cst_18 {dimension_numbers = #tpu.dot_dimension_numbers<[1], [0], [0], [1], [0, 0, 1, 1], [], []>} : vector<2x256xbf16>, vector<256x128xbf16>, vector<2x128xf32> -> vector<2x128xf32>
    %c0_19 = arith.constant 0 : index
    %c0_20 = arith.constant 0 : index
    %23 = vector.load %arg7[%c0_19, %c0_20] : memref<1x128xf32, #tpu.memory_space<vmem>>, vector<1x128xf32>
    %24 = vector.broadcast %23 : vector<1x128xf32> to vector<2x128xf32>
    %25 = arith.addf %22, %24 : vector<2x128xf32>
    %cst_21 = arith.constant dense<0xFF800000> : vector<2xf32>
    %26 = vector.multi_reduction <maximumf>, %25, %cst_21 [1] : vector<2x128xf32> to vector<2xf32>
    %27 = vector.shape_cast %26 : vector<2xf32> to vector<2x1xf32>
    %28 = vector.broadcast %27 : vector<2x1xf32> to vector<2x128xf32>
    %29 = arith.subf %25, %28 : vector<2x128xf32>
    %30 = math.exp %29 : vector<2x128xf32>
    %cst_22 = arith.constant dense<0.000000e+00> : vector<2xf32>
    %31 = vector.multi_reduction <add>, %30, %cst_22 [1] : vector<2x128xf32> to vector<2xf32>
    %32 = vector.shape_cast %31 : vector<2xf32> to vector<2x1xf32>
    %33 = vector.broadcast %32 : vector<2x1xf32> to vector<2x128xf32>
    %34 = arith.divf %30, %33 : vector<2x128xf32>
    %c0_23 = arith.constant 0 : index
    %c0_24 = arith.constant 0 : index
    %35 = vector.load %arg8[%c0_23, %c0_24] : memref<2x128xf32, #tpu.memory_space<vmem>>, vector<2x128xf32>
    tpu.vector_store %arg8[%c0_23, %c0_24], %34 {strides = array<i32>} : memref<2x128xf32, #tpu.memory_space<vmem>>, vector<2x128xf32>,
    return
  }
  func.func @transform_0(%arg0: i32) -> (i32, i32, i32) {
    %c0_i32 = arith.constant 0 : i32
    %c0_i32_0 = arith.constant 0 : i32
    %c0_i32_1 = arith.constant 0 : i32
    return %arg0, %c0_i32, %c0_i32_0 : i32, i32, i32
  }
  func.func @transform_1(%arg0: i32) -> (i32, i32) {
    %c0_i32 = arith.constant 0 : i32
    %c0_i32_0 = arith.constant 0 : i32
    %c0_i32_1 = arith.constant 0 : i32
    return %c0_i32, %c0_i32_0 : i32, i32
  }
  func.func @transform_2(%arg0: i32) -> (i32, i32) {
    %c0_i32 = arith.constant 0 : i32
    %c0_i32_0 = arith.constant 0 : i32
    %c0_i32_1 = arith.constant 0 : i32
    return %c0_i32, %c0_i32_0 : i32, i32
  }
  func.func @transform_3(%arg0: i32) -> (i32, i32) {
    %c0_i32 = arith.constant 0 : i32
    %c0_i32_0 = arith.constant 0 : i32
    %c0_i32_1 = arith.constant 0 : i32
    return %c0_i32, %c0_i32_0 : i32, i32
  }
  func.func @transform_4(%arg0: i32) -> (i32, i32) {
    %c0_i32 = arith.constant 0 : i32
    %c0_i32_0 = arith.constant 0 : i32
    %c0_i32_1 = arith.constant 0 : i32
    return %c0_i32, %c0_i32_0 : i32, i32
  }
  func.func @transform_5(%arg0: i32) -> (i32, i32) {
    %c0_i32 = arith.constant 0 : i32
    %c0_i32_0 = arith.constant 0 : i32
    %c0_i32_1 = arith.constant 0 : i32
    return %c0_i32, %c0_i32_0 : i32, i32
  }
  func.func @transform_6(%arg0: i32) -> (i32, i32) {
    %c0_i32 = arith.constant 0 : i32
    %c0_i32_0 = arith.constant 0 : i32
    %c0_i32_1 = arith.constant 0 : i32
    return %c0_i32, %c0_i32_0 : i32, i32
  }
  func.func @transform_7(%arg0: i32) -> (i32, i32) {
    %c0_i32 = arith.constant 0 : i32
    %c0_i32_0 = arith.constant 0 : i32
    return %arg0, %c0_i32 : i32, i32
  }
  func.func @transform_8(%arg0: i32) -> (i32, i32) {
    %c0_i32 = arith.constant 0 : i32
    %c0_i32_0 = arith.constant 0 : i32
    return %arg0, %c0_i32 : i32, i32
  }
}

</mosaic_0001>

<bundles_post_ra>
// kernel: google_net_head.1
= control target key start
LH: loop header
LB: loop body
LE: loop exit
PB: predicated region body
PF: predicated region fallthrough
CT: control target
= control target key end

     0   :  { %14 = vsyncpa [#allocation3], 0  ;;  %s7303_s0 = inlined_call_operand.vmem [shape: bf16[2,16,1024], index: 0, kind: input, shape index: {}]   ;;  %s7304_s1 = inlined_call_operand.vmem [shape: bf16[1024,512], index: 1, kind: input, shape index: {}]   ;;  %s7305_s2 = inlined_call_operand.vmem [shape: f32[1,512], index: 2, kind: input, shape index: {}]   ;;  %s7306_s3 = inlined_call_operand.vmem [shape: bf16[512,256], index: 3, kind: input, shape index: {}]   ;;  %s7307_s4 = inlined_call_operand.vmem [shape: f32[1,256], index: 4, kind: input, shape index: {}]   ;;  %s7308_s5 = inlined_call_operand.vmem [shape: bf16[256,128], index: 5, kind: input, shape index: {}]   ;;  %s7309_s6 = inlined_call_operand.vmem [shape: f32[1,128], index: 6, kind: input, shape index: {}]   ;;  %s7310_s7 = inlined_call_operand.hbm [shape: f32[2,128], index: 7, kind: output, shape index: {0}]   ;;  %s7311_s8 = inlined_call_operand.hbm [shape: f32[2,1024], index: 8, kind: output, shape index: {1}]  }
   0x1   :  { %v3145_v0 = vld [vmem:[%s7304_s1 + $0xe0] sm:$0xf]  ;;  %v4405_v1 = vld [vmem:[%s7304_s1 + $0xec] sm:$0xf0] }
   0x2   :  { %v3273_v2 = vld [vmem:[%s7304_s1 + $0x1e0] sm:$0xf]  ;;  %v3146_v3 = vor.u32 %v4405_v1, %v3145_v0  ;;  %v4437_v4 = vld [vmem:[%s7304_s1 + $0x1ec] sm:$0xf0] }
   0x3   :  { %v3401_v5 = vld [vmem:[%s7304_s1 + $0x2e0] sm:$0xf]  ;;  %v4469_v6 = vld [vmem:[%s7304_s1 + $0x2ec] sm:$0xf0]  ;;  %v3274_v7 = vor.u32 %v4437_v4, %v3273_v2 }
   0x4   :  { %v3402_v8 = vor.u32 %v4469_v6, %v3401_v5  ;;  %v3529_v9 = vld [vmem:[%s7304_s1 + $0x3e0] sm:$0xf]  ;;  %v4501_v10 = vld [vmem:[%s7304_s1 + $0x3ec] sm:$0xf0]  ;;  %1898 = vmatpush.bf16.msra.mxu0 %v3146_v3 }
   0x5   :  { %v3129_v11 = vld [vmem:[%s7304_s1 + $0xc0] sm:$0xf]  ;;  %v3530_v12 = vor.u32 %v4501_v10, %v3529_v9  ;;  %v4401_v13 = vld [vmem:[%s7304_s1 + $0xcc] sm:$0xf0]  ;;  %1911 = vmatpush.bf16.msra.mxu1 %v3274_v7 }
   0x6   :  { %v3257_v14 = vld [vmem:[%s7304_s1 + $0x1c0] sm:$0xf]  ;;  %v4433_v15 = vld [vmem:[%s7304_s1 + $0x1cc] sm:$0xf0]  ;;  %1924 = vmatpush.bf16.msra.mxu2 %v3402_v8  ;;  %v3130_v16 = vor.u32 %v4401_v13, %v3129_v11 }
   0x7   :  { %v3258_v17 = vor.u32 %v4433_v15, %v3257_v14  ;;  %v3385_v18 = vld [vmem:[%s7304_s1 + $0x2c0] sm:$0xf]  ;;  %v4465_v19 = vld [vmem:[%s7304_s1 + $0x2cc] sm:$0xf0]  ;;  %1937 = vmatpush.bf16.msra.mxu3 %v3530_v12 }
   0x8   :  { %v3513_v20 = vld [vmem:[%s7304_s1 + $0x3c0] sm:$0xf]  ;;  %v3386_v21 = vor.u32 %v4465_v19, %v3385_v18  ;;  %v4497_v22 = vld [vmem:[%s7304_s1 + $0x3cc] sm:$0xf0]  ;;  %1899 = vmatpush.bf16.msra.mxu0 %v3130_v16 }
   0x9   :  { %v3113_v23 = vld [vmem:[%s7304_s1 + $0xa0] sm:$0xf]  ;;  %v4397_v24 = vld [vmem:[%s7304_s1 + $0xac] sm:$0xf0]  ;;  %v3514_v25 = vor.u32 %v4497_v22, %v3513_v20  ;;  %1912 = vmatpush.bf16.msra.mxu1 %v3258_v17 }
   0xa   :  { %v3241_v26 = vld [vmem:[%s7304_s1 + $0x1a0] sm:$0xf]  ;;  %v4429_v27 = vld [vmem:[%s7304_s1 + $0x1ac] sm:$0xf0]  ;;  %v3114_v29 = vor.u32 %v4397_v24, %v3113_v23  ;;  %1925 = vmatpush.bf16.msra.mxu2 %v3386_v21 }
   0xb   :  { %v3369_v28 = vld [vmem:[%s7304_s1 + $0x2a0] sm:$0xf]  ;;  %v4461_v30 = vld [vmem:[%s7304_s1 + $0x2ac] sm:$0xf0]  ;;  %v3242_v33 = vor.u32 %v4429_v27, %v3241_v26  ;;  %1938 = vmatpush.bf16.msra.mxu3 %v3514_v25 }
   0xc   :  { %v3497_v31 = vld [vmem:[%s7304_s1 + $0x3a0] sm:$0xf]  ;;  %v4493_v32 = vld [vmem:[%s7304_s1 + $0x3ac] sm:$0xf0]  ;;  %v3370_v34 = vor.u32 %v4461_v30, %v3369_v28  ;;  %1900 = vmatpush.bf16.msra.mxu0 %v3114_v29 }
   0xd   :  { %v3097_v35 = vld [vmem:[%s7304_s1 + $0x80] sm:$0xf]  ;;  %v4393_v36 = vld [vmem:[%s7304_s1 + $0x8c] sm:$0xf0]  ;;  %v3498_v38 = vor.u32 %v4493_v32, %v3497_v31  ;;  %1913 = vmatpush.bf16.msra.mxu1 %v3242_v33 }
   0xe   :  { %v3225_v37 = vld [vmem:[%s7304_s1 + $0x180] sm:$0xf]  ;;  %v4425_v39 = vld [vmem:[%s7304_s1 + $0x18c] sm:$0xf0]  ;;  %v3098_v44 = vor.u32 %v4393_v36, %v3097_v35  ;;  %1926 = vmatpush.bf16.msra.mxu2 %v3370_v34 }
   0xf   :  { %v3353_v40 = vld [vmem:[%s7304_s1 + $0x280] sm:$0xf]  ;;  %v4457_v41 = vld [vmem:[%s7304_s1 + $0x28c] sm:$0xf0]  ;;  %v3226_v45 = vor.u32 %v4425_v39, %v3225_v37  ;;  %1939 = vmatpush.bf16.msra.mxu3 %v3498_v38 }
  0x10   :  { %v3481_v42 = vld [vmem:[%s7304_s1 + $0x380] sm:$0xf]  ;;  %v4489_v43 = vld [vmem:[%s7304_s1 + $0x38c] sm:$0xf0]  ;;  %v3354_v46 = vor.u32 %v4457_v41, %v3353_v40  ;;  %1901 = vmatpush.bf16.msra.mxu0 %v3098_v44 }
  0x11   :  { %v3081_v47 = vld [vmem:[%s7304_s1 + $0x60] sm:$0xf]  ;;  %v4389_v48 = vld [vmem:[%s7304_s1 + $0x6c] sm:$0xf0]  ;;  %v3482_v50 = vor.u32 %v4489_v43, %v3481_v42  ;;  %1914 = vmatpush.bf16.msra.mxu1 %v3226_v45 }
  0x12   :  { %v3209_v49 = vld [vmem:[%s7304_s1 + $0x160] sm:$0xf]  ;;  %v4421_v51 = vld [vmem:[%s7304_s1 + $0x16c] sm:$0xf0]  ;;  %v3082_v56 = vor.u32 %v4389_v48, %v3081_v47  ;;  %1927 = vmatpush.bf16.msra.mxu2 %v3354_v46 }
  0x13   :  { %v3337_v52 = vld [vmem:[%s7304_s1 + $0x260] sm:$0xf]  ;;  %v4453_v53 = vld [vmem:[%s7304_s1 + $0x26c] sm:$0xf0]  ;;  %v3210_v57 = vor.u32 %v4421_v51, %v3209_v49  ;;  %1940 = vmatpush.bf16.msra.mxu3 %v3482_v50 }
  0x14   :  { %v3465_v54 = vld [vmem:[%s7304_s1 + $0x360] sm:$0xf]  ;;  %v4485_v55 = vld [vmem:[%s7304_s1 + $0x36c] sm:$0xf0]  ;;  %v3338_v58 = vor.u32 %v4453_v53, %v3337_v52  ;;  %1902 = vmatpush.bf16.msra.mxu0 %v3082_v56 }
  0x15   :  { %v3065_v59 = vld [vmem:[%s7304_s1 + $0x40] sm:$0xf]  ;;  %v4385_v60 = vld [vmem:[%s7304_s1 + $0x4c] sm:$0xf0]  ;;  %v3466_v62 = vor.u32 %v4485_v55, %v3465_v54  ;;  %1915 = vmatpush.bf16.msra.mxu1 %v3210_v57 }
  0x16   :  { %v3193_v61 = vld [vmem:[%s7304_s1 + $0x140] sm:$0xf]  ;;  %v4417_v63 = vld [vmem:[%s7304_s1 + $0x14c] sm:$0xf0]  ;;  %v3066_v4 = vor.u32 %v4385_v60, %v3065_v59  ;;  %1928 = vmatpush.bf16.msra.mxu2 %v3338_v58 }
  0x17   :  { %v3321_v0 = vld [vmem:[%s7304_s1 + $0x240] sm:$0xf]  ;;  %v4449_v1 = vld [vmem:[%s7304_s1 + $0x24c] sm:$0xf0]  ;;  %v3194_v6 = vor.u32 %v4417_v63, %v3193_v61  ;;  %1941 = vmatpush.bf16.msra.mxu3 %v3466_v62 }
  0x18   :  { %v3449_v2 = vld [vmem:[%s7304_s1 + $0x340] sm:$0xf]  ;;  %v4481_v3 = vld [vmem:[%s7304_s1 + $0x34c] sm:$0xf0]  ;;  %v3322_v7 = vor.u32 %v4449_v1, %v3321_v0  ;;  %1903 = vmatpush.bf16.msra.mxu0 %v3066_v4 }
  0x19   :  { %v3049_v5 = vld [vmem:[%s7304_s1 + $0x20] sm:$0xf]  ;;  %v4381_v8 = vld [vmem:[%s7304_s1 + $0x2c] sm:$0xf0]  ;;  %v3450_v11 = vor.u32 %v4481_v3, %v3449_v2  ;;  %1916 = vmatpush.bf16.msra.mxu1 %v3194_v6 }
  0x1a   :  { %v3177_v9 = vld [vmem:[%s7304_s1 + $0x120] sm:$0xf]  ;;  %v4413_v10 = vld [vmem:[%s7304_s1 + $0x12c] sm:$0xf0]  ;;  %v3050_v18 = vor.u32 %v4381_v8, %v3049_v5  ;;  %1929 = vmatpush.bf16.msra.mxu2 %v3322_v7 }
  0x1b   :  { %v3305_v12 = vld [vmem:[%s7304_s1 + $0x220] sm:$0xf]  ;;  %v4445_v13 = vld [vmem:[%s7304_s1 + $0x22c] sm:$0xf0]  ;;  %v3178_v23 = vor.u32 %v4413_v10, %v3177_v9  ;;  %1942 = vmatpush.bf16.msra.mxu3 %v3450_v11 }
  0x1c   :  { %v3433_v14 = vld [vmem:[%s7304_s1 + $0x320] sm:$0xf]  ;;  %v4477_v15 = vld [vmem:[%s7304_s1 + $0x32c] sm:$0xf0]  ;;  %v3306_v24 = vor.u32 %v4445_v13, %v3305_v12  ;;  %1904 = vmatpush.bf16.msra.mxu0 %v3050_v18 }
  0x1d   :  { %v3033_v16 = vld [vmem:[%s7304_s1] sm:$0xf]  ;;  %v4377_v17 = vld [vmem:[%s7304_s1 + $0xc] sm:$0xf0]  ;;  %v3434_v28 = vor.u32 %v4477_v15, %v3433_v14  ;;  %1917 = vmatpush.bf16.msra.mxu1 %v3178_v23 }
  0x1e   :  { %v3161_v19 = vld [vmem:[%s7304_s1 + $0x100] sm:$0xf]  ;;  %v4409_v20 = vld [vmem:[%s7304_s1 + $0x10c] sm:$0xf0]  ;;  %v3034_v35 = vor.u32 %v4377_v17, %v3033_v16  ;;  %1930 = vmatpush.bf16.msra.mxu2 %v3306_v24 }
  0x1f   :  { %v3289_v21 = vld [vmem:[%s7304_s1 + $0x200] sm:$0xf]  ;;  %v4441_v22 = vld [vmem:[%s7304_s1 + $0x20c] sm:$0xf0]  ;;  %v3162_v39 = vor.u32 %v4409_v20, %v3161_v19  ;;  %1943 = vmatpush.bf16.msra.mxu3 %v3434_v28 }
  0x20   :  { %v3417_v25 = vld [vmem:[%s7304_s1 + $0x300] sm:$0xf]  ;;  %v4473_v26 = vld [vmem:[%s7304_s1 + $0x30c] sm:$0xf0]  ;;  %v3290_v40 = vor.u32 %v4441_v22, %v3289_v21  ;;  %1905 = vmatpush.bf16.msra.mxu0 %v3034_v35 }
  0x21   :  { %v3657_v27 = vld [vmem:[%s7304_s1 + $0x4e0] sm:$0xf]  ;;  %v4533_v29 = vld [vmem:[%s7304_s1 + $0x4ec] sm:$0xf0]  ;;  %v3418_v47 = vor.u32 %v4473_v26, %v3417_v25  ;;  %1918 = vmatpush.bf16.msra.mxu1 %v3162_v39  ;;  %v35_v39 = vld [vmem:[%s7303_s0 + $0x28] sm:$0xff] }
  0x22   :  { %v3785_v30 = vld [vmem:[%s7304_s1 + $0x5e0] sm:$0xf]  ;;  %v4565_v31 = vld [vmem:[%s7304_s1 + $0x5ec] sm:$0xf0]  ;;  %v3658_v48 = vor.u32 %v4533_v29, %v3657_v27  ;;  %1931 = vmatpush.bf16.msra.mxu2 %v3290_v40 }
  0x23   :  { %v3913_v32 = vld [vmem:[%s7304_s1 + $0x6e0] sm:$0xf]  ;;  %v4597_v33 = vld [vmem:[%s7304_s1 + $0x6ec] sm:$0xf0]  ;;  %v3786_v55 = vor.u32 %v4565_v31, %v3785_v30  ;;  %1944 = vmatpush.bf16.msra.mxu3 %v3418_v47 }
  0x24   :  { %v4041_v34 = vld [vmem:[%s7304_s1 + $0x7e0] sm:$0xf]  ;;  %v4629_v36 = vld [vmem:[%s7304_s1 + $0x7ec] sm:$0xf0]  ;;  %v3914_v56 = vor.u32 %v4597_v33, %v3913_v32  ;;  %1950 = vmatpush.bf16.msrb.mxu0 %v3658_v48 }
  0x25   :  { %v5041_v37 = vld [vmem:[%s7304_s1 + $0x4c0] sm:$0xf]  ;;  %v5046_v38 = vld [vmem:[%s7304_s1 + $0x4cc] sm:$0xf0]  ;;  %v4042_v0 = vor.u32 %v4629_v36, %v4041_v34  ;;  %1963 = vmatpush.bf16.msrb.mxu1 %v3786_v55 }
  0x26   :  { %v5051_v41 = vld [vmem:[%s7304_s1 + $0x5c0] sm:$0xf]  ;;  %v5056_v42 = vld [vmem:[%s7304_s1 + $0x5cc] sm:$0xf0]  ;;  %v3642_v4 = vor.u32 %v5046_v38, %v5041_v37  ;;  %1976 = vmatpush.bf16.msrb.mxu2 %v3914_v56  ;;  %v31_v38 = vld [vmem:[%s7303_s0 + $0x8] sm:$0xff] }
  0x27   :  { %v5061_v43 = vld [vmem:[%s7304_s1 + $0x6c0] sm:$0xf]  ;;  %v5066_v44 = vld [vmem:[%s7304_s1 + $0x6cc] sm:$0xf0]  ;;  %v3770_v8 = vor.u32 %v5056_v42, %v5051_v41  ;;  %1989 = vmatpush.bf16.msrb.mxu3 %v4042_v0  ;;  %v39_v41 = vld [vmem:[%s7303_s0 + $0x48] sm:$0xff] }
  0x28   :  { %v5071_v45 = vld [vmem:[%s7304_s1 + $0x7c0] sm:$0xf]  ;;  %v5076_v46 = vld [vmem:[%s7304_s1 + $0x7cc] sm:$0xf0]  ;;  %v3898_v9 = vor.u32 %v5066_v44, %v5061_v43  ;;  %1951 = vmatpush.bf16.msrb.mxu0 %v3642_v4  ;;  %v43_v42 = vld [vmem:[%s7303_s0 + $0x68] sm:$0xff]  ;;  %v48_v43 = vunpack.c.l.bf16 %v31_v38  ;;  %v56_v44 = vunpack.c.l.bf16 %v35_v39  ;;  %v64_v47 = vunpack.c.l.bf16 %v39_v41 }
  0x29   :  { %v5081_v49 = vld [vmem:[%s7304_s1 + $0x4a0] sm:$0xf]  ;;  %v5086_v50 = vld [vmem:[%s7304_s1 + $0x4ac] sm:$0xf0]  ;;  %v4026_v10 = vor.u32 %v5076_v46, %v5071_v45  ;;  %1964 = vmatpush.bf16.msrb.mxu1 %v3770_v8  ;;  %v4774_v45 = vmov 16.0   ;;  %v72_v48 = vunpack.c.l.bf16 %v43_v42  ;;  %v57_v8 = vunpack.c.h.bf16 %v35_v39 }
  0x2a   :  { %v5091_v51 = vld [vmem:[%s7304_s1 + $0x5a0] sm:$0xf]  ;;  %v5096_v52 = vld [vmem:[%s7304_s1 + $0x5ac] sm:$0xf0]  ;;  %v3626_v14 = vor.u32 %v5086_v50, %v5081_v49  ;;  %1977 = vmatpush.bf16.msrb.mxu2 %v3898_v9  ;;  %4715 = vrcp.f32 %v4774_v45  ;;  %v65_v9 = vunpack.c.h.bf16 %v39_v41 }
  0x2b   :  { %v5101_v53 = vld [vmem:[%s7304_s1 + $0x6a0] sm:$0xf]  ;;  %v5106_v54 = vld [vmem:[%s7304_s1 + $0x6ac] sm:$0xf0]  ;;  %v3754_v15 = vor.u32 %v5096_v52, %v5091_v51  ;;  %1990 = vmatpush.bf16.msrb.mxu3 %v4026_v10  ;;  %v148_v4 = vadd.f32 %v72_v48, %v64_v47  ;;  %v73_v10 = vunpack.c.h.bf16 %v43_v42 }
  0x2c   :  { %v5111_v57 = vld [vmem:[%s7304_s1 + $0x7a0] sm:$0xf]  ;;  %v5116_v58 = vld [vmem:[%s7304_s1 + $0x7ac] sm:$0xf0]  ;;  %v3882_v16 = vor.u32 %v5106_v54, %v5101_v53  ;;  %v49_v53 = vunpack.c.h.bf16 %v31_v38  ;;  %v92_v54 = vadd.f32 %v56_v44, %v48_v43  ;;  %1952 = vmatpush.bf16.msrb.mxu0 %v3626_v14 }
  0x2d   :  { %v5121_v59 = vld [vmem:[%s7304_s1 + $0x480] sm:$0xf]  ;;  %v5126_v60 = vld [vmem:[%s7304_s1 + $0x48c] sm:$0xf0]  ;;  %v4010_v20 = vor.u32 %v5116_v58, %v5111_v57  ;;  %1965 = vmatpush.bf16.msrb.mxu1 %v3754_v15  ;;  %v149_v47 = vrot.slane %v148_v4, 4 }
  0x2e   :  { %v5131_v61 = vld [vmem:[%s7304_s1 + $0x580] sm:$0xf]  ;;  %v5136_v62 = vld [vmem:[%s7304_s1 + $0x58c] sm:$0xf0]  ;;  %v3610_v21 = vor.u32 %v5126_v60, %v5121_v59  ;;  %1978 = vmatpush.bf16.msrb.mxu2 %v3882_v16  ;;  %v93_v14 = vrot.slane %v92_v54, 4  ;;  %v99_v15 = vadd.f32 %v57_v8, %v49_v53  ;;  %v155_v16 = vadd.f32 %v73_v10, %v65_v9 }
  0x2f   :  { %v5141_v63 = vld [vmem:[%s7304_s1 + $0x680] sm:$0xf]  ;;  %v5146_v1 = vld [vmem:[%s7304_s1 + $0x68c] sm:$0xf0]  ;;  %v3738_v22 = vor.u32 %v5136_v62, %v5131_v61  ;;  %1991 = vmatpush.bf16.msrb.mxu3 %v4010_v20  ;;  %v150_v40 = vadd.f32 %v149_v47, %v148_v4 }
  0x30   :  { %v5151_v2 = vld [vmem:[%s7304_s1 + $0x780] sm:$0xf]  ;;  %v5156_v3 = vld [vmem:[%s7304_s1 + $0x78c] sm:$0xf0]  ;;  %v3866_v23 = vor.u32 %v5146_v1, %v5141_v63  ;;  %v4716_v44 = vpop.eup %4715  ;;  %1953 = vmatpush.bf16.msrb.mxu0 %v3610_v21  ;;  %v100_v20 = vrot.slane %v99_v15, 4  ;;  %v156_v10 = vrot.slane %v155_v16, 4 }
  0x31   :  { %v5163_v5 = vld [vmem:[%s7304_s1 + $0x460] sm:$0xf]  ;;  %v5168_v6 = vld [vmem:[%s7304_s1 + $0x46c] sm:$0xf0]  ;;  %v3994_v27 = vor.u32 %v5156_v3, %v5151_v2  ;;  %v191_v35 = vmul.f32 16.0, %v4716_v44  ;;  %1966 = vmatpush.bf16.msrb.mxu1 %v3738_v22 }
  0x32   :  { %v5173_v7 = vld [vmem:[%s7304_s1 + $0x560] sm:$0xf]  ;;  %v5184_v11 = vld [vmem:[%s7304_s1 + $0x56c] sm:$0xf0]  ;;  %v3594_v28 = vor.u32 %v5168_v6, %v5163_v5  ;;  %1979 = vmatpush.bf16.msrb.mxu2 %v3866_v23 }
  0x33   :  { %v5189_v12 = vld [vmem:[%s7304_s1 + $0x660] sm:$0xf]  ;;  %v5194_v13 = vld [vmem:[%s7304_s1 + $0x66c] sm:$0xf0]  ;;  %v3722_v29 = vor.u32 %v5184_v11, %v5173_v7 }
  0x34   :  { %v5205_v17 = vld [vmem:[%s7304_s1 + $0x760] sm:$0xf]  ;;  %v5210_v18 = vld [vmem:[%s7304_s1 + $0x76c] sm:$0xf0]  ;;  %v3850_v30 = vor.u32 %v5194_v13, %v5189_v12 }
  0x35   :  { %v5215_v19 = vld [vmem:[%s7304_s1 + $0x440] sm:$0xf]  ;;  %v5228_v24 = vld [vmem:[%s7304_s1 + $0x44c] sm:$0xf0]  ;;  %v3978_v33 = vor.u32 %v5210_v18, %v5205_v17 }
  0x36   :  { %v5233_v25 = vld [vmem:[%s7304_s1 + $0x540] sm:$0xf]  ;;  %v5238_v26 = vld [vmem:[%s7304_s1 + $0x54c] sm:$0xf0]  ;;  %v3578_v34 = vor.u32 %v5228_v24, %v5215_v19 }
  0x37   :  { %v5251_v31 = vld [vmem:[%s7304_s1 + $0x640] sm:$0xf]  ;;  %v5256_v32 = vld [vmem:[%s7304_s1 + $0x64c] sm:$0xf0] }
  0x38   :  { %v5267_v36 = vld [vmem:[%s7304_s1 + $0x740] sm:$0xf]  ;;  %v5272_v37 = vld [vmem:[%s7304_s1 + $0x74c] sm:$0xf0] }
  0x39   :  { %v5291_v46 = vld [vmem:[%s7303_s0] sm:$0xff]  ;;  %v5320_v0 = vld [vmem:[%s7304_s1 + $0x42c] sm:$0xf0] }
  0x3a   :  { %v5296_v49 = vld [vmem:[%s7303_s0 + $0x20] sm:$0xff]  ;;  %v46_v52 = vunpack.c.l.bf16 %v5291_v46  ;;  %v5330_v43 = vld [vmem:[%s7304_s1 + $0x52c] sm:$0xf0] }
  0x3b   :  { %v5301_v50 = vld [vmem:[%s7303_s0 + $0x40] sm:$0xff]  ;;  %v54_v55 = vunpack.c.l.bf16 %v5296_v49  ;;  %v5342_v42 = vld [vmem:[%s7304_s1 + $0x62c] sm:$0xf0] }
  0x3c   :  { %v5306_v51 = vld [vmem:[%s7303_s0 + $0x60] sm:$0xff]  ;;  %v62_v56 = vunpack.c.l.bf16 %v5301_v50 }
  0x3d   :  { %v70_v57 = vunpack.c.l.bf16 %v5306_v51  ;;  %v5315_v58 = vld [vmem:[%s7304_s1 + $0x420] sm:$0xf]  ;;  %v78_v45 = vadd.f32 %v54_v55, %v46_v52  ;;  %v94_v52 = vadd.f32 %v93_v14, %v92_v54 }
  0x3e   :  { %v5325_v38 = vld [vmem:[%s7304_s1 + $0x520] sm:$0xf]  ;;  %v3562_v48 = vor.u32 %v5320_v0, %v5315_v58 }
  0x3f   :  { %v134_v39 = vadd.f32 %v70_v57, %v62_v56  ;;  %v5337_v41 = vld [vmem:[%s7304_s1 + $0x620] sm:$0xf]  ;;  %v79_v55 = vrot.slane %v78_v45, 4  ;;  %v3690_v57 = vor.u32 %v5330_v43, %v5325_v38  ;;  %v95_v54 = vrot.slane %v94_v52, 2 }
  0x40   :  { %v3818_v53 = vor.u32 %v5342_v42, %v5337_v41 }
  0x41   :  { %v135_v56 = vrot.slane %v134_v39, 4  ;;  %v80_v8 = vadd.f32 %v79_v55, %v78_v45 }
  0x43   :  { %v136_v9 = vadd.f32 %v135_v56, %v134_v39 }
  0x44   :  { %15 = vsyncpa [#allocation5], 0  ;;  %1992 = vmatpush.bf16.msrb.mxu3 %v3994_v27  ;;  %v151_v59 = vrot.slane %v150_v40, 2  ;;  %v192_v60 = vsub.f32 1.0, %v191_v35  ;;  %vm195_vm0 = vweird.f32 %v4716_v44  ;;  %v101_v21 = vadd.f32 %v100_v20, %v99_v15  ;;  %1954 = vmatpush.bf16.msrb.mxu0 %v3594_v28  ;;  %v3945_v5 = vld [vmem:[%s7304_s1 + $0x720] sm:$0xf] }
  0x45   :  { %v96_v4 = vadd.f32 %v95_v54, %v94_v52  ;;  %v81_v61 = vrot.slane %v80_v8, 2  ;;  %v137_v62 = vrot.slane %v136_v9, 2  ;;  %v157_v22 = vadd.f32 %v156_v10, %v155_v16  ;;  %1967 = vmatpush.bf16.msrb.mxu1 %v3722_v29  ;;  %1980 = vmatpush.bf16.msrb.mxu2 %v3850_v30  ;;  %v4605_v6 = vld [vmem:[%s7304_s1 + $0x72c] sm:$0xf0]  ;;  %v5454_v10 = vld [vmem:[%s7303_s0 + $0x18] sm:$0xff]  ;;  %s3017_s21 = sshll.u32 %s7311_s8, 4  ;;  %s3018_s21 = int_to_ptr.hbm [resolvable:$true] %s3017_s21 }
  0x46   :  { %v152_v63 = vadd.f32 %v151_v59, %v150_v40  ;;  %v193_v1 = vmul.f32 %v4716_v44, %v192_v60  ;;  %v102_v23 = vrot.slane %v101_v21, 2  ;;  %v47_v14 = vunpack.c.h.bf16 %v5291_v46  ;;  %v4505_v38 = vld [vmem:[%s7304_s1 + $0x40c] sm:$0xf0]  ;;  %s4776_s8 = smov [#allocation2]  }
  0x47   :  { %v97_v2 = vrot.slane %v96_v4, 1  ;;  %v82_v3 = vadd.f32 %v81_v61, %v80_v8  ;;  %v138_v27 = vadd.f32 %v137_v62, %v136_v9  ;;  %v158_v35 = vrot.slane %v157_v22, 2  ;;  %v4537_v8 = vld [vmem:[%s7304_s1 + $0x50c] sm:$0xf0]  ;;  %v3801_v9 = vld [vmem:[%s7304_s1 + $0x600] sm:$0xf] }
  0x48   :  { %1993 = vmatpush.bf16.msrb.mxu3 %v3978_v33  ;;  %v153_v7 = vrot.slane %v152_v63, 1  ;;  %v194_v11 = vadd.f32 %v4716_v44, %v193_v1  ;;  %v103_v12 = vadd.f32 %v102_v23, %v101_v21  ;;  %v55_v13 = vunpack.c.h.bf16 %v5296_v49  ;;  %1955 = vmatpush.bf16.msrb.mxu0 %v3578_v34  ;;  %v3929_v61 = vld [vmem:[%s7304_s1 + $0x700] sm:$0xf]  ;;  %v4601_v62 = vld [vmem:[%s7304_s1 + $0x70c] sm:$0xf0]  ;;  %s3004_s22 = sshll.u32 %s4776_s8, 4  ;;  %s3005_s22 = int_to_ptr.vmem [resolvable:$true] %s3004_s22 }
  0x49   :  { %v98_v28 = vadd.f32 %v97_v2, %v96_v4  ;;  %v83_v29 = vrot.slane %v82_v3, 1  ;;  %v139_v30 = vrot.slane %v138_v27, 1  ;;  %v159_v40 = vadd.f32 %v158_v35, %v157_v22  ;;  %v4569_v4 = vld [vmem:[%s7304_s1 + $0x60c] sm:$0xf0]  ;;  %v3147_v2 = vld [vmem:[%s7304_s1 + $0xf0] sm:$0xf0] }
  0x4a   :  { %v154_v46 = vadd.f32 %v153_v7, %v152_v63  ;;  %v5386_v45 = vsel %vm195_vm0, %v4716_v44, %v194_v11  ;;  %v104_v39 = vrot.slane %v103_v12, 1  ;;  %v3946_v17 = vor.u32 %v4605_v6, %v3945_v5  ;;  %v4467_v7 = vld [vmem:[%s7304_s1 + $0x2e4] sm:$0xf]  ;;  %v3403_v11 = vld [vmem:[%s7304_s1 + $0x2f0] sm:$0xf0] }
  0x4b   :  { %v7312_v18 = vor.u32 %v5238_v26, %v5233_v25  ;;  %v7313_v33 = vor.u32 %v5256_v32, %v5251_v31  ;;  %v5395_v49 = vmul.f32 %v5386_v45, %v98_v28  ;;  %v84_v47 = vadd.f32 %v83_v29, %v82_v3  ;;  %v5480_v3 = vld [vmem:[%s7303_s0 + $0x38] sm:$0xff] }
  0x4c   :  { %v140_v19 = vadd.f32 %v139_v30, %v138_v27  ;;  %v160_v24 = vrot.slane %v159_v40, 1  ;;  %v7314_v34 = vor.u32 %v5272_v37, %v5267_v36  ;;  %v5401_v44 = vmul.f32 %v5386_v45, %v154_v46  ;;  %1956 = vmatpush.bf16.msrb.mxu0 %v3562_v48  ;;  %v3545_v48 = vld [vmem:[%s7304_s1 + $0x400] sm:$0xf]  ;;  %v3531_v46 = vld [vmem:[%s7304_s1 + $0x3f0] sm:$0xf0] }
  0x4d   :  { %1968 = vmatpush.bf16.msrb.mxu1 %v7312_v18  ;;  %1981 = vmatpush.bf16.msrb.mxu2 %v7313_v33  ;;  %v105_v15 = vadd.f32 %v104_v39, %v103_v12  ;;  %v63_v25 = vunpack.c.h.bf16 %v5301_v50  ;;  %v85_v26 = vadd.f32 %v55_v13, %v47_v14  ;;  %v282_v31 = vpack.c.bf16 %v5395_v49, %v5395_v49  ;;  %v4403_v14 = vld [vmem:[%s7304_s1 + $0xe4] sm:$0xf]  ;;  %v5496_v13 = vld [vmem:[%s7303_s0 + $0x58] sm:$0xff] }
  0x4e   :  { %1994 = vmatpush.bf16.msrb.mxu3 %v7314_v34  ;;  %v5407_v32 = vmul.f32 %v5386_v45, %v84_v47  ;;  %v5410_v16 = vmul.f32 %v5386_v45, %v140_v19  ;;  %v71_v52 = vunpack.c.h.bf16 %v5306_v51  ;;  %vm261_vm1 = vcmask 1041409   ;;  %v4499_v12 = vld [vmem:[%s7304_s1 + $0x3e4] sm:$0xf]  ;;  %v3387_v19 = vld [vmem:[%s7304_s1 + $0x2d0] sm:$0xf0] }
  0x4f   :  { %v290_v36 = vpack.c.bf16 %v5401_v44, %v5401_v44  ;;  %v161_v37 = vadd.f32 %v160_v24, %v159_v40  ;;  %v5416_v55 = vmul.f32 %v5386_v45, %v105_v15  ;;  %v580_v50 = vunpack.c.l.b16 %v282_v31  ;;  %v4399_v39 = vld [vmem:[%s7304_s1 + $0xc4] sm:$0xf]  ;;  %v5519_v24 = vld [vmem:[%s7303_s0 + $0x78] sm:$0xff] }
  0x50   :  { %v280_v56 = vpack.c.bf16 %v5407_v32, %v5407_v32  ;;  %v288_v20 = vpack.c.bf16 %v5410_v16, %v5410_v16  ;;  %v86_v51 = vrot.slane %v85_v26, 4  ;;  %v3546_v5 = vor.u32 %v4505_v38, %v3545_v48  ;;  %v4463_v47 = vld [vmem:[%s7304_s1 + $0x2c4] sm:$0xf] }
  0x51   :  { %1969 = vmatpush.bf16.msrb.mxu1 %v3690_v57  ;;  %1982 = vmatpush.bf16.msrb.mxu2 %v3818_v53  ;;  %v588_v54 = vunpack.c.l.b16 %v290_v36  ;;  %v5432_v58 = vmul.f32 %v5386_v45, %v161_v37  ;;  %v283_v0 = vpack.c.bf16 %v5416_v55, %v5416_v55  ;;  %v141_v57 = vadd.f32 %v71_v52, %v63_v25  ;;  %v3673_v53 = vld [vmem:[%s7304_s1 + $0x500] sm:$0xf]  ;;  %v4495_v52 = vld [vmem:[%s7304_s1 + $0x3c4] sm:$0xf]  ;;  %v3515_v36 = vld [vmem:[%s7304_s1 + $0x3d0] sm:$0xf0] }
  0x52   :  { %1995 = vmatpush.bf16.msrb.mxu3 %v3946_v17  ;;  %v578_v43 = vunpack.c.l.b16 %v280_v56  ;;  %v586_v41 = vunpack.c.l.b16 %v288_v20  ;;  %v87_v42 = vadd.f32 %v86_v51, %v85_v26  ;;  %v3674_v6 = vor.u32 %v4537_v8, %v3673_v53  ;;  %v3131_v17 = vld [vmem:[%s7304_s1 + $0xd0] sm:$0xf0]  ;;  %1957 = vmatpush.bf16.msrb.mxu0 %v3546_v5  ;;  %v4395_v20 = vld [vmem:[%s7304_s1 + $0xa4] sm:$0xf] }
  0x53   :  { %v596_v59 = vsel %vm261_vm1, %v588_v54, %v580_v50  ;;  %v291_v60 = vpack.c.bf16 %v5432_v58, %v5432_v58  ;;  %v581_v21 = vunpack.c.l.b16 %v283_v0  ;;  %v142_v23 = vrot.slane %v141_v57, 4  ;;  %v3115_v51 = vld [vmem:[%s7304_s1 + $0xb0] sm:$0xf0] }
  0x54   :  { %v5468_v22 = vpack.c.b16 %v596_v59, %v596_v59  ;;  %v594_v63 = vsel %vm261_vm1, %v586_v41, %v578_v43  ;;  %v88_v1 = vrot.slane %v87_v42, 2  ;;  %v3802_v30 = vor.u32 %v4569_v4, %v3801_v9  ;;  %v4459_v43 = vld [vmem:[%s7304_s1 + $0x2a4] sm:$0xf]  ;;  %v3371_v41 = vld [vmem:[%s7304_s1 + $0x2b0] sm:$0xf0] }
  0x55   :  { %v5482_v27 = vpack.c.b16 %v594_v63, %v594_v63  ;;  %v589_v35 = vunpack.c.l.b16 %v291_v60  ;;  %v143_v29 = vadd.f32 %v142_v23, %v141_v57  ;;  %v3930_v40 = vor.u32 %v4601_v62, %v3929_v61  ;;  %1970 = vmatpush.bf16.msrb.mxu1 %v3674_v6  ;;  %v4491_v9 = vld [vmem:[%s7304_s1 + $0x3a4] sm:$0xf]  ;;  %v3499_v59 = vld [vmem:[%s7304_s1 + $0x3b0] sm:$0xf0] }
  0x56   :  { %1932 = vmatmul.bf16.vlgmr.msra.gmra.mxu2 %v5468_v22  ;;  %v89_v28 = vadd.f32 %v88_v1, %v87_v42  ;;  %v3150_v33 = vor.u32 %v4403_v14, %v3147_v2  ;;  %v52_v34 = vunpack.c.l.bf16 %v5454_v10  ;;  %v3406_v31 = vor.u32 %v4467_v7, %v3403_v11  ;;  %v5548_v42 = vld [vmem:[%s7303_s0 + $0x10] sm:$0xff]  ;;  %v5578_v1 = vld [vmem:[%s7304_s1 + $0x1e4] sm:$0xf] }
  0x57   :  { %1906 = vmatmul.bf16.vlgmr.msra.gmra.mxu0 %v5482_v27  ;;  %v597_v18 = vsel %vm261_vm1, %v589_v35, %v581_v21  ;;  %v144_v26 = vrot.slane %v143_v29, 2  ;;  %1983 = vmatpush.bf16.msrb.mxu2 %v3802_v30  ;;  %v3534_v37 = vor.u32 %v4499_v12, %v3531_v46  ;;  %v3134_v50 = vor.u32 %v4399_v39, %v3131_v17  ;;  %v5560_v60 = vld [vmem:[%s7303_s0 + $0x30] sm:$0xff] }
  0x58   :  { %v5522_v15 = vpack.c.b16 %v597_v18, %v597_v18  ;;  %v90_v25 = vrot.slane %v89_v28, 1  ;;  %1996 = vmatpush.bf16.msrb.mxu3 %v3930_v40  ;;  %2002 = vmatpush.bf16.msra.mxu0 %v3150_v33  ;;  %v60_v56 = vunpack.c.l.bf16 %v5480_v3  ;;  %v3390_v48 = vor.u32 %v4463_v47, %v3387_v19  ;;  %v5568_v62 = vld [vmem:[%s7303_s0 + $0x50] sm:$0xff] }
  0x59   :  { %v145_v0 = vadd.f32 %v144_v26, %v143_v29  ;;  %v68_v38 = vunpack.c.l.bf16 %v5496_v13  ;;  %v3518_v57 = vor.u32 %v4495_v52, %v3515_v36  ;;  %v76_v53 = vunpack.c.l.bf16 %v5519_v24  ;;  %v5573_v63 = vld [vmem:[%s7303_s0 + $0x70] sm:$0xff]  ;;  %s3006_s0 = sshll.u32 %s7310_s7, 4  ;;  %s3007_s0 = int_to_ptr.hbm [resolvable:$true] %s3006_s0 }
  0x5a   :  { %1945 = vmatmul.bf16.vlgmr.msra.gmra.mxu3 %v5522_v15  ;;  %v91_v54 = vadd.f32 %v90_v25, %v89_v28  ;;  %v120_v8 = vadd.f32 %v60_v56, %v52_v34  ;;  %v3118_v61 = vor.u32 %v4395_v20, %v3115_v51  ;;  %v3275_v23 = vld [vmem:[%s7304_s1 + $0x1f0] sm:$0xf0]  ;;  %v3374_v35 = vor.u32 %v4459_v43, %v3371_v41 }
  0x5b   :  { %2028 = vmatpush.bf16.msra.mxu2 %v3406_v31  ;;  %v146_v21 = vrot.slane %v145_v0, 1  ;;  %v176_v2 = vadd.f32 %v76_v53, %v68_v38  ;;  %v50_v5 = vunpack.c.l.bf16 %v5548_v42  ;;  %v3502_v11 = vor.u32 %v4491_v9, %v3499_v59 }
  0x5c   :  { %2041 = vmatpush.bf16.msra.mxu3 %v3534_v37  ;;  %v5563_v4 = vmul.f32 %v5386_v45, %v91_v54  ;;  %2003 = vmatpush.bf16.msra.mxu0 %v3134_v50  ;;  %v121_v14 = vrot.slane %v120_v8, 4  ;;  %v58_v12 = vunpack.c.l.bf16 %v5560_v60  ;;  %v66_v30 = vunpack.c.l.bf16 %v5568_v62 }
  0x5d   :  { %v147_v6 = vadd.f32 %v146_v21, %v145_v0  ;;  %v177_v29 = vrot.slane %v176_v2, 4  ;;  %v74_v40 = vunpack.c.l.bf16 %v5573_v63  ;;  %v3278_v39 = vor.u32 %v5578_v1, %v3275_v23  ;;  %v3259_v0 = vld [vmem:[%s7304_s1 + $0x1d0] sm:$0xf0] }
  0x5e   :  { %v281_v7 = vpack.c.bf16 %v5563_v4, %v5563_v4  ;;  %v122_v28 = vadd.f32 %v121_v14, %v120_v8  ;;  %v106_v17 = vadd.f32 %v58_v12, %v50_v5  ;;  %v53_v18 = vunpack.c.h.bf16 %v5454_v10 }
  0x5f   :  { %2029 = vmatpush.bf16.msra.mxu2 %v3390_v48  ;;  %v5590_v46 = vmul.f32 %v5386_v45, %v147_v6  ;;  %v178_v47 = vadd.f32 %v177_v29, %v176_v2  ;;  %v162_v19 = vadd.f32 %v74_v40, %v66_v30  ;;  %v61_v34 = vunpack.c.h.bf16 %v5480_v3  ;;  %v4431_v3 = vld [vmem:[%s7304_s1 + $0x1c4] sm:$0xf]  ;;  %v3243_v6 = vld [vmem:[%s7304_s1 + $0x1b0] sm:$0xf0] }
  0x60   :  { %2042 = vmatpush.bf16.msra.mxu3 %v3518_v57  ;;  %v123_v33 = vrot.slane %v122_v28, 2  ;;  %2004 = vmatpush.bf16.msra.mxu0 %v3118_v61  ;;  %v579_v26 = vunpack.c.l.b16 %v281_v7  ;;  %v107_v31 = vrot.slane %v106_v17, 4  ;;  %v69_v52 = vunpack.c.h.bf16 %v5496_v13 }
  0x61   :  { %v289_v25 = vpack.c.bf16 %v5590_v46, %v5590_v46  ;;  %v179_v37 = vrot.slane %v178_v47, 2  ;;  %v163_v50 = vrot.slane %v162_v19, 4  ;;  %v77_v10 = vunpack.c.h.bf16 %v5519_v24 }
  0x62   :  { %v124_v36 = vadd.f32 %v123_v33, %v122_v28  ;;  %v108_v20 = vadd.f32 %v107_v31, %v106_v17  ;;  %v127_v51 = vadd.f32 %v61_v34, %v53_v18  ;;  %v51_v54 = vunpack.c.h.bf16 %v5548_v42 }
  0x63   :  { %2030 = vmatpush.bf16.msra.mxu2 %v3374_v35  ;;  %v587_v56 = vunpack.c.l.b16 %v289_v25  ;;  %v180_v48 = vadd.f32 %v179_v37, %v178_v47  ;;  %v164_v38 = vadd.f32 %v163_v50, %v162_v19  ;;  %v183_v43 = vadd.f32 %v77_v10, %v69_v52  ;;  %v4391_v47 = vld [vmem:[%s7304_s1 + $0x84] sm:$0xf]  ;;  %v3099_v19 = vld [vmem:[%s7304_s1 + $0x90] sm:$0xf0] }
  0x64   :  { %2043 = vmatpush.bf16.msra.mxu3 %v3502_v11  ;;  %v125_v13 = vrot.slane %v124_v36, 1  ;;  %v109_v24 = vrot.slane %v108_v20, 2  ;;  %v128_v57 = vrot.slane %v127_v51, 4  ;;  %v59_v53 = vunpack.c.h.bf16 %v5560_v60  ;;  %v4427_v60 = vld [vmem:[%s7304_s1 + $0x1a4] sm:$0xf] }
  0x65   :  { %v595_v41 = vsel %vm261_vm1, %v587_v56, %v579_v26  ;;  %v181_v9 = vrot.slane %v180_v48, 1  ;;  %v165_v59 = vrot.slane %v164_v38, 2  ;;  %v3262_v21 = vor.u32 %v4431_v3, %v3259_v0  ;;  %v4423_v50 = vld [vmem:[%s7304_s1 + $0x184] sm:$0xf]  ;;  %v3227_v10 = vld [vmem:[%s7304_s1 + $0x190] sm:$0xf0] }
  0x66   :  { %v5608_v8 = vpack.c.b16 %v595_v41, %v595_v41  ;;  %v126_v42 = vadd.f32 %v125_v13, %v124_v36  ;;  %v110_v61 = vadd.f32 %v109_v24, %v108_v20  ;;  %v129_v1 = vadd.f32 %v128_v57, %v127_v51 }
  0x67   :  { %v184_v23 = vrot.slane %v183_v43, 4  ;;  %v182_v14 = vadd.f32 %v181_v9, %v180_v48  ;;  %v166_v35 = vadd.f32 %v165_v59, %v164_v38  ;;  %v67_v5 = vunpack.c.h.bf16 %v5568_v62  ;;  %v4455_v38 = vld [vmem:[%s7304_s1 + $0x284] sm:$0xf]  ;;  %v3483_v9 = vld [vmem:[%s7304_s1 + $0x390] sm:$0xf0] }
  0x68   :  { %1919 = vmatmul.bf16.vlgmr.msra.gmra.mxu1 %v5608_v8  ;;  %v5612_v2 = vmul.f32 %v5386_v45, %v126_v42  ;;  %v111_v7 = vrot.slane %v110_v61, 1  ;;  %v130_v11 = vrot.slane %v129_v1, 2  ;;  %v113_v28 = vadd.f32 %v59_v53, %v51_v54  ;;  %v4487_v42 = vld [vmem:[%s7304_s1 + $0x384] sm:$0xf] }
  0x69   :  { %2015 = vmatpush.bf16.msra.mxu1 %v3278_v39  ;;  %v185_v12 = vadd.f32 %v184_v23, %v183_v43  ;;  %v5622_v29 = vmul.f32 %v5386_v45, %v182_v14  ;;  %v167_v62 = vrot.slane %v166_v35, 1  ;;  %v75_v40 = vunpack.c.h.bf16 %v5573_v63  ;;  %v3355_v43 = vld [vmem:[%s7304_s1 + $0x290] sm:$0xf0]  ;;  %v4387_v23 = vld [vmem:[%s7304_s1 + $0x64] sm:$0xf] }
  0x6a   :  { %v286_v30 = vpack.c.bf16 %v5612_v2, %v5612_v2  ;;  %v112_v39 = vadd.f32 %v111_v7, %v110_v61  ;;  %v131_v17 = vadd.f32 %v130_v11, %v129_v1  ;;  %v114_v33 = vrot.slane %v113_v28, 4  ;;  %v3083_v14 = vld [vmem:[%s7304_s1 + $0x70] sm:$0xf0]  ;;  %v4419_v7 = vld [vmem:[%s7304_s1 + $0x164] sm:$0xf] }
  0x6b   :  { %v186_v18 = vrot.slane %v185_v12, 2  ;;  %v294_v34 = vpack.c.bf16 %v5622_v29, %v5622_v29  ;;  %v3246_v26 = vor.u32 %v4427_v60, %v3243_v6  ;;  %v168_v31 = vadd.f32 %v167_v62, %v166_v35  ;;  %v3211_v11 = vld [vmem:[%s7304_s1 + $0x170] sm:$0xf0] }
  0x6c   :  { %v584_v25 = vunpack.c.l.b16 %v286_v30  ;;  %v5636_v63 = vmul.f32 %v5386_v45, %v112_v39  ;;  %v132_v52 = vrot.slane %v131_v17, 1  ;;  %v115_v37 = vadd.f32 %v114_v33, %v113_v28  ;;  %v4483_v39 = vld [vmem:[%s7304_s1 + $0x364] sm:$0xf] }
  0x6d   :  { %2016 = vmatpush.bf16.msra.mxu1 %v3262_v21  ;;  %v187_v36 = vadd.f32 %v186_v18, %v185_v12  ;;  %v592_v56 = vunpack.c.l.b16 %v294_v34  ;;  %v5645_v20 = vmul.f32 %v5386_v45, %v168_v31  ;;  %v169_v51 = vadd.f32 %v75_v40, %v67_v5  ;;  %v4451_v12 = vld [vmem:[%s7304_s1 + $0x264] sm:$0xf]  ;;  %v3339_v40 = vld [vmem:[%s7304_s1 + $0x270] sm:$0xf0] }
  0x6e   :  { %v3102_v54 = vor.u32 %v4391_v47, %v3099_v19  ;;  %v284_v3 = vpack.c.bf16 %v5636_v63, %v5636_v63  ;;  %v133_v0 = vadd.f32 %v132_v52, %v131_v17  ;;  %v116_v48 = vrot.slane %v115_v37, 2  ;;  %v3467_v17 = vld [vmem:[%s7304_s1 + $0x370] sm:$0xf0]  ;;  %v4383_v34 = vld [vmem:[%s7304_s1 + $0x44] sm:$0xf] }
  0x6f   :  { %v188_v13 = vrot.slane %v187_v36, 1  ;;  %v600_v41 = vsel %vm261_vm1, %v592_v56, %v584_v25  ;;  %v292_v24 = vpack.c.bf16 %v5645_v20, %v5645_v20  ;;  %v170_v57 = vrot.slane %v169_v51, 4  ;;  %v3067_v25 = vld [vmem:[%s7304_s1 + $0x50] sm:$0xf0] }
  0x70   :  { %2005 = vmatpush.bf16.msra.mxu0 %v3102_v54  ;;  %v3230_v53 = vor.u32 %v4423_v50, %v3227_v10  ;;  %v5664_v59 = vpack.c.b16 %v600_v41, %v600_v41  ;;  %v582_v21 = vunpack.c.l.b16 %v284_v3  ;;  %v5667_v1 = vmul.f32 %v5386_v45, %v133_v0  ;;  %v3323_v50 = vld [vmem:[%s7304_s1 + $0x250] sm:$0xf0]  ;;  %v4479_v0 = vld [vmem:[%s7304_s1 + $0x344] sm:$0xf] }
  0x71   :  { %2017 = vmatpush.bf16.msra.mxu1 %v3246_v26  ;;  %v189_v61 = vadd.f32 %v188_v13, %v187_v36  ;;  %v590_v35 = vunpack.c.l.b16 %v292_v24  ;;  %v117_v5 = vadd.f32 %v116_v48, %v115_v37  ;;  %v171_v60 = vadd.f32 %v170_v57, %v169_v51  ;;  %v4415_v36 = vld [vmem:[%s7304_s1 + $0x144] sm:$0xf]  ;;  %v3195_v3 = vld [vmem:[%s7304_s1 + $0x150] sm:$0xf0] }
  0x72   :  { %v3358_v6 = vor.u32 %v4455_v38, %v3355_v43  ;;  %1984 = vmatmul.bf16.vlgmr.msrb.gmra.mxu2 %v5664_v59  ;;  %v287_v30 = vpack.c.bf16 %v5667_v1, %v5667_v1  ;;  %v3486_v62 = vor.u32 %v4487_v42, %v3483_v9  ;;  %v3086_v19 = vor.u32 %v4387_v23, %v3083_v14  ;;  %v4447_v37 = vld [vmem:[%s7304_s1 + $0x244] sm:$0xf]  ;;  %v3451_v13 = vld [vmem:[%s7304_s1 + $0x350] sm:$0xf0] }
  0x73   :  { %v5686_v28 = vmul.f32 %v5386_v45, %v189_v61  ;;  %v598_v18 = vsel %vm261_vm1, %v590_v35, %v582_v21  ;;  %v118_v33 = vrot.slane %v117_v5, 1  ;;  %v172_v47 = vrot.slane %v171_v60, 2  ;;  %v4379_v41 = vld [vmem:[%s7304_s1 + $0x24] sm:$0xf]  ;;  %v3051_v24 = vld [vmem:[%s7304_s1 + $0x30] sm:$0xf0] }
  0x74   :  { %2031 = vmatpush.bf16.msra.mxu2 %v3358_v6  ;;  %v5706_v26 = vpack.c.b16 %v598_v18, %v598_v18  ;;  %v585_v52 = vunpack.c.l.b16 %v287_v30  ;;  %2044 = vmatpush.bf16.msra.mxu3 %v3486_v62  ;;  %v3214_v51 = vor.u32 %v4419_v7, %v3211_v11  ;;  %v3342_v54 = vor.u32 %v4451_v12, %v3339_v40  ;;  %v4411_v23 = vld [vmem:[%s7304_s1 + $0x124] sm:$0xf]  ;;  %v3307_v35 = vld [vmem:[%s7304_s1 + $0x230] sm:$0xf0] }
  0x75   :  { %v295_v31 = vpack.c.bf16 %v5686_v28, %v5686_v28  ;;  %2018 = vmatpush.bf16.msra.mxu1 %v3230_v53  ;;  %v119_v10 = vadd.f32 %v118_v33, %v117_v5  ;;  %v173_v56 = vadd.f32 %v172_v47, %v171_v60  ;;  %2006 = vmatpush.bf16.msra.mxu0 %v3086_v19  ;;  %v4443_v14 = vld [vmem:[%s7304_s1 + $0x224] sm:$0xf]  ;;  %v3179_v11 = vld [vmem:[%s7304_s1 + $0x130] sm:$0xf0]  ;;  %vm241_vm2 = vcmask 1041408  }
  0x76   :  { %1958 = vmatmul.bf16.vlgmr.msrb.gmra.mxu0 %v5706_v26  ;;  %v3470_v38 = vor.u32 %v4483_v39, %v3467_v17  ;;  %v3070_v43 = vor.u32 %v4383_v34, %v3067_v25  ;;  %v3326_v42 = vor.u32 %v4447_v37, %v3323_v50  ;;  %v3198_v21 = vor.u32 %v4415_v36, %v3195_v3  ;;  %v4475_v12 = vld [vmem:[%s7304_s1 + $0x324] sm:$0xf]  ;;  %v3435_v30 = vld [vmem:[%s7304_s1 + $0x330] sm:$0xf0] }
  0x77   :  { %v593_v48 = vunpack.c.l.b16 %v295_v31  ;;  %v174_v57 = vrot.slane %v173_v56, 1  ;;  %v5736_v53 = vmul.f32 %v5386_v45, %v119_v10  ;;  %v3454_v61 = vor.u32 %v4479_v0, %v3451_v13  ;;  %v4375_v62 = vld [vmem:[%s7304_s1 + $0x4] sm:$0xf]  ;;  %v3035_v40 = vld [vmem:[%s7304_s1 + $0x10] sm:$0xf0] }
  0x78   :  { %2032 = vmatpush.bf16.msra.mxu2 %v3342_v54  ;;  %2045 = vmatpush.bf16.msra.mxu3 %v3470_v38  ;;  %v3054_v7 = vor.u32 %v4379_v41, %v3051_v24  ;;  %v3310_v17 = vor.u32 %v4443_v14, %v3307_v35  ;;  %v4531_v18 = vld [vmem:[%s7304_s1 + $0x4e4] sm:$0xf]  ;;  %v3659_v33 = vld [vmem:[%s7304_s1 + $0x4f0] sm:$0xf0]  ;;  %v3182_v47 = vor.u32 %v4411_v23, %v3179_v11  ;;  %vm243_vm3 = vcmask 1045508  }
  0x79   :  { %v601_v9 = vsel %vm261_vm1, %v593_v48, %v585_v52  ;;  %2019 = vmatpush.bf16.msra.mxu1 %v3214_v51  ;;  %v175_v60 = vadd.f32 %v174_v57, %v173_v56  ;;  %v285_v6 = vpack.c.bf16 %v5736_v53, %v5736_v53  ;;  %2007 = vmatpush.bf16.msra.mxu0 %v3070_v43  ;;  %v4407_v34 = vld [vmem:[%s7304_s1 + $0x104] sm:$0xf]  ;;  %v3291_v25 = vld [vmem:[%s7304_s1 + $0x210] sm:$0xf0]  ;;  %vm245_vm4 = vcmask 1043456  }
  0x7a   :  { %v5748_v5 = vpack.c.b16 %v601_v9, %v601_v9  ;;  %v3438_v19 = vor.u32 %v4475_v12, %v3435_v30  ;;  %v3038_v36 = vor.u32 %v4375_v62, %v3035_v40  ;;  %v3163_v37 = vld [vmem:[%s7304_s1 + $0x110] sm:$0xf0]  ;;  %v4471_v50 = vld [vmem:[%s7304_s1 + $0x304] sm:$0xf]  ;;  %v3662_v56 = vor.u32 %v4531_v18, %v3659_v33 }
  0x7b   :  { %v5769_v39 = vmul.f32 %v5386_v45, %v175_v60  ;;  %v4439_v45 = vld [vmem:[%s7304_s1 + $0x204] sm:$0xf]  ;;  %v583_v52 = vunpack.c.l.b16 %v285_v6  ;;  %v3419_v10 = vld [vmem:[%s7304_s1 + $0x310] sm:$0xf0]  ;;  %v3166_v9 = vor.u32 %v4407_v34, %v3163_v37  ;;  %vm263_vm5 = vcmask 1043459  }
  0x7c   :  { %1997 = vmatmul.bf16.vlgmr.msrb.gmra.mxu3 %v5748_v5  ;;  %2033 = vmatpush.bf16.msra.mxu2 %v3326_v42  ;;  %v4563_v51 = vld [vmem:[%s7304_s1 + $0x5e4] sm:$0xf]  ;;  %v3915_v3 = vld [vmem:[%s7304_s1 + $0x6f0] sm:$0xf0]  ;;  %v3294_v13 = vor.u32 %v4439_v45, %v3291_v25  ;;  %v3422_v41 = vor.u32 %v4471_v50, %v3419_v10  ;;  %vm265_vm6 = vcmask 1045509   ;;  %vm267_vm7 = vcmask 1047559  }
  0x7d   :  { %2020 = vmatpush.bf16.msra.mxu1 %v3198_v21  ;;  %2046 = vmatpush.bf16.msra.mxu3 %v3454_v61  ;;  %v293_v31 = vpack.c.bf16 %v5769_v39, %v5769_v39  ;;  %v4595_v54 = vld [vmem:[%s7304_s1 + $0x6e4] sm:$0xf]  ;;  %v3787_v48 = vld [vmem:[%s7304_s1 + $0x5f0] sm:$0xf0] }
  0x7e   :  { %2008 = vmatpush.bf16.msra.mxu0 %v3054_v7  ;;  %v4627_v38 = vld [vmem:[%s7304_s1 + $0x7e4] sm:$0xf]  ;;  %v4043_v43 = vld [vmem:[%s7304_s1 + $0x7f0] sm:$0xf0]  ;;  %v3918_v21 = vor.u32 %v4595_v54, %v3915_v3  ;;  %v3790_v23 = vor.u32 %v4563_v51, %v3787_v48 }
  0x7f   :  { %v591_v0 = vunpack.c.l.b16 %v293_v31  ;;  %v4527_v24 = vld [vmem:[%s7304_s1 + $0x4c4] sm:$0xf]  ;;  %v3643_v57 = vld [vmem:[%s7304_s1 + $0x4d0] sm:$0xf0]  ;;  %v4046_v14 = vor.u32 %v4627_v38, %v4043_v43 }
  0x80   :  { %2034 = vmatpush.bf16.msra.mxu2 %v3310_v17  ;;  %v4559_v35 = vld [vmem:[%s7304_s1 + $0x5c4] sm:$0xf]  ;;  %v3899_v6 = vld [vmem:[%s7304_s1 + $0x6d0] sm:$0xf0]  ;;  %v3646_v7 = vor.u32 %v4527_v24, %v3643_v57 }
  0x81   :  { %2021 = vmatpush.bf16.msra.mxu1 %v3182_v47  ;;  %2047 = vmatpush.bf16.msra.mxu3 %v3438_v19  ;;  %v599_v42 = vsel %vm261_vm1, %v591_v0, %v583_v52  ;;  %v4591_v60 = vld [vmem:[%s7304_s1 + $0x6c4] sm:$0xf]  ;;  %v3771_v11 = vld [vmem:[%s7304_s1 + $0x5d0] sm:$0xf0] }
  0x82   :  { %2009 = vmatpush.bf16.msra.mxu0 %v3038_v36  ;;  %v5822_v61 = vpack.c.b16 %v599_v42, %v599_v42  ;;  %v4623_v12 = vld [vmem:[%s7304_s1 + $0x7c4] sm:$0xf]  ;;  %v4027_v30 = vld [vmem:[%s7304_s1 + $0x7d0] sm:$0xf0]  ;;  %v3902_v17 = vor.u32 %v4591_v60, %v3899_v6  ;;  %v3774_v18 = vor.u32 %v4559_v35, %v3771_v11 }
  0x83   :  { %v4523_v62 = vld [vmem:[%s7304_s1 + $0x4a4] sm:$0xf]  ;;  %v3627_v40 = vld [vmem:[%s7304_s1 + $0x4b0] sm:$0xf0]  ;;  %v4030_v33 = vor.u32 %v4623_v12, %v4027_v30 }
  0x84   :  { %2035 = vmatpush.bf16.msra.mxu2 %v3294_v13  ;;  %1971 = vmatmul.bf16.vlgmr.msrb.gmra.mxu1 %v5822_v61  ;;  %v4555_v47 = vld [vmem:[%s7304_s1 + $0x5a4] sm:$0xf]  ;;  %v3883_v34 = vld [vmem:[%s7304_s1 + $0x6b0] sm:$0xf0]  ;;  %v3630_v45 = vor.u32 %v4523_v62, %v3627_v40 }
  0x85   :  { %2048 = vmatpush.bf16.msra.mxu3 %v3422_v41  ;;  %2022 = vmatpush.bf16.msra.mxu1 %v3166_v9  ;;  %v4587_v19 = vld [vmem:[%s7304_s1 + $0x6a4] sm:$0xf]  ;;  %v3755_v25 = vld [vmem:[%s7304_s1 + $0x5b0] sm:$0xf0] }
  0x86   :  { %2054 = vmatpush.bf16.msrb.mxu0 %v3662_v56  ;;  %v4619_v31 = vld [vmem:[%s7304_s1 + $0x7a4] sm:$0xf]  ;;  %v4011_v52 = vld [vmem:[%s7304_s1 + $0x7b0] sm:$0xf0]  ;;  %v3886_v50 = vor.u32 %v4587_v19, %v3883_v34  ;;  %v3758_v10 = vor.u32 %v4555_v47, %v3755_v25 }
  0x87   :  { %2036 = vmatmul.bf16.vlgmr.msra.gmra.mxu2 %v5468_v22  ;;  %v4519_v36 = vld [vmem:[%s7304_s1 + $0x484] sm:$0xf]  ;;  %v3611_v37 = vld [vmem:[%s7304_s1 + $0x490] sm:$0xf0]  ;;  %2010 = vmatmul.bf16.vlgmr.msra.gmra.mxu0 %v5482_v27  ;;  %v4014_v56 = vor.u32 %v4619_v31, %v4011_v52 }
  0x88   :  { %2080 = vmatpush.bf16.msrb.mxu2 %v3918_v21  ;;  %v4551_v51 = vld [vmem:[%s7304_s1 + $0x584] sm:$0xf]  ;;  %v3867_v3 = vld [vmem:[%s7304_s1 + $0x690] sm:$0xf0]  ;;  %v3614_v0 = vor.u32 %v4519_v36, %v3611_v37 }
  0x89   :  { %2067 = vmatpush.bf16.msrb.mxu1 %v3790_v23  ;;  %2093 = vmatpush.bf16.msrb.mxu3 %v4046_v14  ;;  %v4583_v54 = vld [vmem:[%s7304_s1 + $0x684] sm:$0xf]  ;;  %v3739_v13 = vld [vmem:[%s7304_s1 + $0x590] sm:$0xf0] }
  0x8a   :  { %2055 = vmatpush.bf16.msrb.mxu0 %v3646_v7  ;;  %v4615_v48 = vld [vmem:[%s7304_s1 + $0x784] sm:$0xf]  ;;  %v3995_v38 = vld [vmem:[%s7304_s1 + $0x790] sm:$0xf0]  ;;  %v3870_v24 = vor.u32 %v4583_v54, %v3867_v3  ;;  %v3742_v57 = vor.u32 %v4551_v51, %v3739_v13 }
  0x8b   :  { %v4515_v43 = vld [vmem:[%s7304_s1 + $0x464] sm:$0xf]  ;;  %v3595_v41 = vld [vmem:[%s7304_s1 + $0x470] sm:$0xf0]  ;;  %v3998_v42 = vor.u32 %v4615_v48, %v3995_v38 }
  0x8c   :  { %2081 = vmatpush.bf16.msrb.mxu2 %v3902_v17  ;;  %2049 = vmatmul.bf16.vlgmr.msra.gmra.mxu3 %v5522_v15  ;;  %v4547_v9 = vld [vmem:[%s7304_s1 + $0x564] sm:$0xf]  ;;  %v3851_v23 = vld [vmem:[%s7304_s1 + $0x670] sm:$0xf0]  ;;  %v3598_v14 = vor.u32 %v4515_v43, %v3595_v41  ;;  %v3153_v41 = vld [vmem:[%s7304_s1 + $0xe8] sm:$0xf] }
  0x8d   :  { %2068 = vmatpush.bf16.msrb.mxu1 %v3774_v18  ;;  %2094 = vmatpush.bf16.msrb.mxu3 %v4030_v33  ;;  %v4579_v21 = vld [vmem:[%s7304_s1 + $0x664] sm:$0xf]  ;;  %v3723_v35 = vld [vmem:[%s7304_s1 + $0x570] sm:$0xf0] }
  0x8e   :  { %2056 = vmatpush.bf16.msrb.mxu0 %v3630_v45  ;;  %v4611_v60 = vld [vmem:[%s7304_s1 + $0x764] sm:$0xf]  ;;  %v3979_v6 = vld [vmem:[%s7304_s1 + $0x770] sm:$0xf0]  ;;  %v3854_v12 = vor.u32 %v4579_v21, %v3851_v23  ;;  %v3726_v30 = vor.u32 %v4547_v9, %v3723_v35 }
  0x8f   :  { %v4511_v7 = vld [vmem:[%s7304_s1 + $0x444] sm:$0xf]  ;;  %v3579_v11 = vld [vmem:[%s7304_s1 + $0x450] sm:$0xf0]  ;;  %v3982_v62 = vor.u32 %v4611_v60, %v3979_v6  ;;  %v3281_v60 = vld [vmem:[%s7304_s1 + $0x1e8] sm:$0xf] }
  0x90   :  { %2082 = vmatpush.bf16.msrb.mxu2 %v3886_v50  ;;  %v4543_v40 = vld [vmem:[%s7304_s1 + $0x544] sm:$0xf]  ;;  %v3835_v18 = vld [vmem:[%s7304_s1 + $0x650] sm:$0xf0]  ;;  %v3582_v33 = vor.u32 %v4511_v7, %v3579_v11  ;;  %v4438_v6 = vld [vmem:[%s7304_s1 + $0x1f4] sm:$0xf0] }
  0x91   :  { %2069 = vmatpush.bf16.msrb.mxu1 %v3758_v10  ;;  %2095 = vmatpush.bf16.msrb.mxu3 %v4014_v56  ;;  %v4575_v17 = vld [vmem:[%s7304_s1 + $0x644] sm:$0xf]  ;;  %v3707_v47 = vld [vmem:[%s7304_s1 + $0x550] sm:$0xf0]  ;;  %v3409_v11 = vld [vmem:[%s7304_s1 + $0x2e8] sm:$0xf] }
  0x92   :  { %2057 = vmatpush.bf16.msrb.mxu0 %v3614_v0  ;;  %v4607_v19 = vld [vmem:[%s7304_s1 + $0x744] sm:$0xf]  ;;  %v3963_v34 = vld [vmem:[%s7304_s1 + $0x750] sm:$0xf0]  ;;  %v3838_v31 = vor.u32 %v4575_v17, %v3835_v18  ;;  %v3710_v52 = vor.u32 %v4543_v40, %v3707_v47  ;;  %v4502_v40 = vld [vmem:[%s7304_s1 + $0x3f4] sm:$0xf0] }
  0x93   :  { %v4507_v45 = vld [vmem:[%s7304_s1 + $0x424] sm:$0xf]  ;;  %v3563_v25 = vld [vmem:[%s7304_s1 + $0x430] sm:$0xf0]  ;;  %v3966_v36 = vor.u32 %v4607_v19, %v3963_v34  ;;  %v3137_v17 = vld [vmem:[%s7304_s1 + $0xc8] sm:$0xf]  ;;  %v3282_v19 = vor.u32 %v4438_v6, %v3281_v60 }
  0x94   :  { %2083 = vmatpush.bf16.msrb.mxu2 %v3870_v24  ;;  %2023 = vmatmul.bf16.vlgmr.msra.gmra.mxu1 %v5608_v8  ;;  %v4539_v37 = vld [vmem:[%s7304_s1 + $0x524] sm:$0xf]  ;;  %v3819_v10 = vld [vmem:[%s7304_s1 + $0x630] sm:$0xf0]  ;;  %v3566_v56 = vor.u32 %v4507_v45, %v3563_v25  ;;  %v4406_v24 = vld [vmem:[%s7304_s1 + $0xf4] sm:$0xf0] }
  0x95   :  { %2070 = vmatpush.bf16.msrb.mxu1 %v3742_v57  ;;  %2096 = vmatpush.bf16.msrb.mxu3 %v3998_v42  ;;  %v4571_v50 = vld [vmem:[%s7304_s1 + $0x624] sm:$0xf]  ;;  %v3691_v51 = vld [vmem:[%s7304_s1 + $0x530] sm:$0xf0]  ;;  %v3154_v7 = vor.u32 %v4406_v24, %v3153_v41  ;;  %v4402_v18 = vld [vmem:[%s7304_s1 + $0xd4] sm:$0xf0] }
  0x96   :  { %2058 = vmatpush.bf16.msrb.mxu0 %v3598_v14  ;;  %v4603_v54 = vld [vmem:[%s7304_s1 + $0x724] sm:$0xf]  ;;  %v3947_v3 = vld [vmem:[%s7304_s1 + $0x730] sm:$0xf0]  ;;  %v3822_v48 = vor.u32 %v4571_v50, %v3819_v10  ;;  %v3694_v57 = vor.u32 %v4539_v37, %v3691_v51  ;;  %v3265_v45 = vld [vmem:[%s7304_s1 + $0x1c8] sm:$0xf] }
  0x97   :  { %v4503_v0 = vld [vmem:[%s7304_s1 + $0x404] sm:$0xf]  ;;  %v3547_v13 = vld [vmem:[%s7304_s1 + $0x410] sm:$0xf0]  ;;  %v3950_v42 = vor.u32 %v4603_v54, %v3947_v3  ;;  %v4434_v25 = vld [vmem:[%s7304_s1 + $0x1d4] sm:$0xf0] }
  0x98   :  { %2084 = vmatpush.bf16.msrb.mxu2 %v3854_v12  ;;  %v4535_v38 = vld [vmem:[%s7304_s1 + $0x504] sm:$0xf]  ;;  %v3675_v43 = vld [vmem:[%s7304_s1 + $0x510] sm:$0xf0]  ;;  %v3550_v14 = vor.u32 %v4503_v0, %v3547_v13  ;;  %v4470_v12 = vld [vmem:[%s7304_s1 + $0x2f4] sm:$0xf0]  ;;  %v3266_v54 = vor.u32 %v4434_v25, %v3265_v45 }
  0x99   :  { %2071 = vmatpush.bf16.msrb.mxu1 %v3726_v30  ;;  %2097 = vmatpush.bf16.msrb.mxu3 %v3982_v62  ;;  %v4567_v9 = vld [vmem:[%s7304_s1 + $0x604] sm:$0xf]  ;;  %v3803_v21 = vld [vmem:[%s7304_s1 + $0x610] sm:$0xf0]  ;;  %v3537_v30 = vld [vmem:[%s7304_s1 + $0x3e8] sm:$0xf]  ;;  %v3410_v34 = vor.u32 %v4470_v12, %v3409_v11 }
  0x9a   :  { %2059 = vmatpush.bf16.msrb.mxu0 %v3582_v33  ;;  %v4599_v23 = vld [vmem:[%s7304_s1 + $0x704] sm:$0xf]  ;;  %v3931_v35 = vld [vmem:[%s7304_s1 + $0x710] sm:$0xf0]  ;;  %v3806_v62 = vor.u32 %v4567_v9, %v3803_v21  ;;  %v3678_v33 = vor.u32 %v4535_v38, %v3675_v43  ;;  %v4466_v37 = vld [vmem:[%s7304_s1 + $0x2d4] sm:$0xf0] }
  0x9b   :  { %v3934_v47 = vor.u32 %v4599_v23, %v3931_v35  ;;  %v3521_v50 = vld [vmem:[%s7304_s1 + $0x3c8] sm:$0xf]  ;;  %v4498_v10 = vld [vmem:[%s7304_s1 + $0x3d4] sm:$0xf0] }
  0x9c   :  { %2085 = vmatpush.bf16.msrb.mxu2 %v3838_v31  ;;  %v3538_v31 = vor.u32 %v4502_v40, %v3537_v30  ;;  %v4398_v51 = vld [vmem:[%s7304_s1 + $0xb4] sm:$0xf0]  ;;  %v3249_v0 = vld [vmem:[%s7304_s1 + $0x1a8] sm:$0xf] }
  0x9d   :  { %2072 = vmatpush.bf16.msrb.mxu1 %v3710_v52  ;;  %2098 = vmatpush.bf16.msrb.mxu3 %v3966_v36  ;;  %v3138_v52 = vor.u32 %v4402_v18, %v3137_v17  ;;  %v3393_v36 = vld [vmem:[%s7304_s1 + $0x2c8] sm:$0xf]  ;;  %v4430_v13 = vld [vmem:[%s7304_s1 + $0x1b4] sm:$0xf0] }
  0x9e   :  { %2060 = vmatpush.bf16.msrb.mxu0 %v3566_v56  ;;  %v3121_v56 = vld [vmem:[%s7304_s1 + $0xa8] sm:$0xf]  ;;  %v3394_v3 = vor.u32 %v4466_v37, %v3393_v36  ;;  %v4462_v41 = vld [vmem:[%s7304_s1 + $0x2b4] sm:$0xf0]  ;;  %v3250_v21 = vor.u32 %v4430_v13, %v3249_v0 }
  0x9f   :  { %v3122_v38 = vor.u32 %v4398_v51, %v3121_v56  ;;  %v3377_v43 = vld [vmem:[%s7304_s1 + $0x2a8] sm:$0xf]  ;;  %v4394_v9 = vld [vmem:[%s7304_s1 + $0x94] sm:$0xf0] }
  0xa0   :  { %2086 = vmatpush.bf16.msrb.mxu2 %v3822_v48  ;;  %v3522_v48 = vor.u32 %v4498_v10, %v3521_v50  ;;  %v3505_v24 = vld [vmem:[%s7304_s1 + $0x3a8] sm:$0xf]  ;;  %v3378_v23 = vor.u32 %v4462_v41, %v3377_v43  ;;  %v4426_v35 = vld [vmem:[%s7304_s1 + $0x194] sm:$0xf0] }
  0xa1   :  { %2073 = vmatpush.bf16.msrb.mxu1 %v3694_v57  ;;  %2099 = vmatpush.bf16.msrb.mxu3 %v3950_v42  ;;  %v4494_v57 = vld [vmem:[%s7304_s1 + $0x3b4] sm:$0xf0]  ;;  %v3105_v42 = vld [vmem:[%s7304_s1 + $0x88] sm:$0xf] }
  0xa2   :  { %2061 = vmatpush.bf16.msrb.mxu0 %v3550_v14  ;;  %v3233_v14 = vld [vmem:[%s7304_s1 + $0x188] sm:$0xf]  ;;  %v3506_v60 = vor.u32 %v4494_v57, %v3505_v24  ;;  %v3106_v6 = vor.u32 %v4394_v9, %v3105_v42  ;;  %v4458_v11 = vld [vmem:[%s7304_s1 + $0x294] sm:$0xf0] }
  0xa3   :  { %v3489_v12 = vld [vmem:[%s7304_s1 + $0x388] sm:$0xf]  ;;  %v4490_v30 = vld [vmem:[%s7304_s1 + $0x394] sm:$0xf0]  ;;  %v3234_v17 = vor.u32 %v4426_v35, %v3233_v14 }
  0xa4   :  { %2087 = vmatpush.bf16.msrb.mxu2 %v3806_v62  ;;  %v3089_v62 = vld [vmem:[%s7304_s1 + $0x68] sm:$0xf]  ;;  %v4390_v40 = vld [vmem:[%s7304_s1 + $0x74] sm:$0xf0] }
  0xa5   :  { %2074 = vmatpush.bf16.msrb.mxu1 %v3678_v33  ;;  %2100 = vmatpush.bf16.msrb.mxu3 %v3934_v47  ;;  %v3217_v33 = vld [vmem:[%s7304_s1 + $0x168] sm:$0xf]  ;;  %v4422_v47 = vld [vmem:[%s7304_s1 + $0x174] sm:$0xf0] }
  0xa6   :  { %2106 = vmatpush.bf16.msra.mxu0 %v3154_v7  ;;  %v3361_v7 = vld [vmem:[%s7304_s1 + $0x288] sm:$0xf]  ;;  %v4454_v25 = vld [vmem:[%s7304_s1 + $0x274] sm:$0xf0]  ;;  %v3218_v50 = vor.u32 %v4422_v47, %v3217_v33 }
  0xa7   :  { %2088 = vmatmul.bf16.vlgmr.msrb.gmra.mxu2 %v5664_v59  ;;  %2062 = vmatmul.bf16.vlgmr.msrb.gmra.mxu0 %v5706_v26  ;;  %v3362_v18 = vor.u32 %v4458_v11, %v3361_v7  ;;  %v3345_v45 = vld [vmem:[%s7304_s1 + $0x268] sm:$0xf]  ;;  %v4386_v37 = vld [vmem:[%s7304_s1 + $0x54] sm:$0xf0] }
  0xa8   :  { %2132 = vmatpush.bf16.msra.mxu2 %v3410_v34  ;;  %2101 = vmatmul.bf16.vlgmr.msrb.gmra.mxu3 %v5748_v5  ;;  %v3090_v34 = vor.u32 %v4390_v40, %v3089_v62  ;;  %v3073_v36 = vld [vmem:[%s7304_s1 + $0x48] sm:$0xf]  ;;  %v3346_v10 = vor.u32 %v4454_v25, %v3345_v45  ;;  %v4418_v51 = vld [vmem:[%s7304_s1 + $0x154] sm:$0xf0] }
  0xa9   :  { %2119 = vmatpush.bf16.msra.mxu1 %v3282_v19  ;;  %2145 = vmatpush.bf16.msra.mxu3 %v3538_v31  ;;  %v3490_v19 = vor.u32 %v4490_v30, %v3489_v12  ;;  %v3473_v31 = vld [vmem:[%s7304_s1 + $0x368] sm:$0xf]  ;;  %v4450_v13 = vld [vmem:[%s7304_s1 + $0x254] sm:$0xf0] }
  0xaa   :  { %2107 = vmatpush.bf16.msra.mxu0 %v3138_v52  ;;  %2075 = vmatmul.bf16.vlgmr.msrb.gmra.mxu1 %v5822_v61  ;;  %v4486_v52 = vld [vmem:[%s7304_s1 + $0x374] sm:$0xf0]  ;;  %v3201_v56 = vld [vmem:[%s7304_s1 + $0x148] sm:$0xf] }
  0xab   :  { %v3329_v0 = vld [vmem:[%s7304_s1 + $0x248] sm:$0xf]  ;;  %v4382_v41 = vld [vmem:[%s7304_s1 + $0x34] sm:$0xf0]  ;;  %v3202_v24 = vor.u32 %v4418_v51, %v3201_v56 }
  0xac   :  { %2133 = vmatpush.bf16.msra.mxu2 %v3394_v3  ;;  %v3074_v3 = vor.u32 %v4386_v37, %v3073_v36  ;;  %v3057_v43 = vld [vmem:[%s7304_s1 + $0x28] sm:$0xf]  ;;  %v3330_v57 = vor.u32 %v4450_v13, %v3329_v0  ;;  %v4414_v9 = vld [vmem:[%s7304_s1 + $0x134] sm:$0xf0] }
  0xad   :  { %2120 = vmatpush.bf16.msra.mxu1 %v3266_v54  ;;  %2146 = vmatpush.bf16.msra.mxu3 %v3522_v48  ;;  %v3474_v54 = vor.u32 %v4486_v52, %v3473_v31  ;;  %v3457_v48 = vld [vmem:[%s7304_s1 + $0x348] sm:$0xf]  ;;  %v4446_v35 = vld [vmem:[%s7304_s1 + $0x234] sm:$0xf0] }
  0xae   :  { %2108 = vmatpush.bf16.msra.mxu0 %v3122_v38  ;;  %v4482_v38 = vld [vmem:[%s7304_s1 + $0x354] sm:$0xf0]  ;;  %v3185_v42 = vld [vmem:[%s7304_s1 + $0x128] sm:$0xf] }
  0xaf   :  { %v3313_v14 = vld [vmem:[%s7304_s1 + $0x228] sm:$0xf]  ;;  %v4378_v11 = vld [vmem:[%s7304_s1 + $0x14] sm:$0xf0]  ;;  %v3186_v62 = vor.u32 %v4414_v9, %v3185_v42 }
  0xb0   :  { %2134 = vmatpush.bf16.msra.mxu2 %v3378_v23  ;;  %v3058_v23 = vor.u32 %v4382_v41, %v3057_v43  ;;  %v3041_v7 = vld [vmem:[%s7304_s1 + $0x8] sm:$0xf]  ;;  %v4534_v30 = vld [vmem:[%s7304_s1 + $0x4f4] sm:$0xf0]  ;;  %v3314_v40 = vor.u32 %v4446_v35, %v3313_v14 }
  0xb1   :  { %2121 = vmatpush.bf16.msra.mxu1 %v3250_v21  ;;  %2147 = vmatpush.bf16.msra.mxu3 %v3506_v60  ;;  %v3458_v21 = vor.u32 %v4482_v38, %v3457_v48  ;;  %v3441_v60 = vld [vmem:[%s7304_s1 + $0x328] sm:$0xf]  ;;  %v4474_v25 = vld [vmem:[%s7304_s1 + $0x314] sm:$0xf0] }
  0xb2   :  { %2109 = vmatpush.bf16.msra.mxu0 %v3106_v6  ;;  %v4478_v6 = vld [vmem:[%s7304_s1 + $0x334] sm:$0xf0]  ;;  %v3665_v12 = vld [vmem:[%s7304_s1 + $0x4e8] sm:$0xf] }
  0xb3   :  { %v3297_v33 = vld [vmem:[%s7304_s1 + $0x208] sm:$0xf]  ;;  %v3442_v47 = vor.u32 %v4478_v6, %v3441_v60  ;;  %v3666_v31 = vor.u32 %v4534_v30, %v3665_v12  ;;  %v4566_v36 = vld [vmem:[%s7304_s1 + $0x5f4] sm:$0xf0] }
  0xb4   :  { %2135 = vmatpush.bf16.msra.mxu2 %v3362_v18  ;;  %v4410_v18 = vld [vmem:[%s7304_s1 + $0x114] sm:$0xf0]  ;;  %v3425_v45 = vld [vmem:[%s7304_s1 + $0x308] sm:$0xf] }
  0xb5   :  { %2122 = vmatpush.bf16.msra.mxu1 %v3234_v17  ;;  %2148 = vmatpush.bf16.msra.mxu3 %v3490_v19  ;;  %v3169_v17 = vld [vmem:[%s7304_s1 + $0x108] sm:$0xf]  ;;  %v3042_v19 = vor.u32 %v4378_v11, %v3041_v7  ;;  %v4630_v56 = vld [vmem:[%s7304_s1 + $0x7f4] sm:$0xf0]  ;;  %v3426_v13 = vor.u32 %v4474_v25, %v3425_v45 }
  0xb6   :  { %2110 = vmatpush.bf16.msra.mxu0 %v3090_v34  ;;  %v4442_v34 = vld [vmem:[%s7304_s1 + $0x214] sm:$0xf0]  ;;  %v3793_v52 = vld [vmem:[%s7304_s1 + $0x5e8] sm:$0xf]  ;;  %v3170_v51 = vor.u32 %v4410_v18, %v3169_v17 }
  0xb7   :  { %v3921_v37 = vld [vmem:[%s7304_s1 + $0x6e8] sm:$0xf]  ;;  %v4530_v0 = vld [vmem:[%s7304_s1 + $0x4d4] sm:$0xf0]  ;;  %v3794_v48 = vor.u32 %v4566_v36, %v3793_v52 }
  0xb8   :  { %2136 = vmatpush.bf16.msra.mxu2 %v3346_v10  ;;  %v4049_v10 = vld [vmem:[%s7304_s1 + $0x7e8] sm:$0xf]  ;;  %v4594_v9 = vld [vmem:[%s7304_s1 + $0x6d4] sm:$0xf0] }
  0xb9   :  { %2123 = vmatpush.bf16.msra.mxu1 %v3218_v50  ;;  %2149 = vmatpush.bf16.msra.mxu3 %v3474_v54  ;;  %v4598_v50 = vld [vmem:[%s7304_s1 + $0x6f4] sm:$0xf0]  ;;  %v3298_v54 = vor.u32 %v4442_v34, %v3297_v33  ;;  %v4050_v43 = vor.u32 %v4630_v56, %v4049_v10  ;;  %v3777_v41 = vld [vmem:[%s7304_s1 + $0x5c8] sm:$0xf] }
  0xba   :  { %2111 = vmatpush.bf16.msra.mxu0 %v3074_v3  ;;  %v3649_v3 = vld [vmem:[%s7304_s1 + $0x4c8] sm:$0xf]  ;;  %v3922_v38 = vor.u32 %v4598_v50, %v3921_v37  ;;  %v4526_v35 = vld [vmem:[%s7304_s1 + $0x4b4] sm:$0xf0] }
  0xbb   :  { %v3650_v42 = vor.u32 %v4530_v0, %v3649_v3  ;;  %v3633_v14 = vld [vmem:[%s7304_s1 + $0x4a8] sm:$0xf]  ;;  %v4558_v12 = vld [vmem:[%s7304_s1 + $0x5b4] sm:$0xf0] }
  0xbc   :  { %2137 = vmatpush.bf16.msra.mxu2 %v3330_v57  ;;  %v3905_v57 = vld [vmem:[%s7304_s1 + $0x6c8] sm:$0xf]  ;;  %v4622_v18 = vld [vmem:[%s7304_s1 + $0x7b4] sm:$0xf0] }
  0xbd   :  { %2124 = vmatpush.bf16.msra.mxu1 %v3202_v24  ;;  %2150 = vmatpush.bf16.msra.mxu3 %v3458_v21  ;;  %v4562_v24 = vld [vmem:[%s7304_s1 + $0x5d4] sm:$0xf0]  ;;  %v4033_v21 = vld [vmem:[%s7304_s1 + $0x7c8] sm:$0xf]  ;;  %v3906_v6 = vor.u32 %v4594_v9, %v3905_v57 }
  0xbe   :  { %2112 = vmatpush.bf16.msra.mxu0 %v3058_v23  ;;  %v4626_v23 = vld [vmem:[%s7304_s1 + $0x7d4] sm:$0xf0]  ;;  %v3778_v60 = vor.u32 %v4562_v24, %v3777_v41  ;;  %v3761_v11 = vld [vmem:[%s7304_s1 + $0x5a8] sm:$0xf] }
  0xbf   :  { %v4034_v7 = vor.u32 %v4626_v23, %v4033_v21  ;;  %v3889_v30 = vld [vmem:[%s7304_s1 + $0x6a8] sm:$0xf]  ;;  %v4586_v37 = vld [vmem:[%s7304_s1 + $0x694] sm:$0xf0] }
  0xc0   :  { %2138 = vmatpush.bf16.msra.mxu2 %v3314_v40  ;;  %v4590_v40 = vld [vmem:[%s7304_s1 + $0x6b4] sm:$0xf0]  ;;  %v4017_v17 = vld [vmem:[%s7304_s1 + $0x7a8] sm:$0xf] }
  0xc1   :  { %2125 = vmatpush.bf16.msra.mxu1 %v3186_v62  ;;  %2151 = vmatpush.bf16.msra.mxu3 %v3442_v47  ;;  %v3634_v62 = vor.u32 %v4526_v35, %v3633_v14  ;;  %v3617_v33 = vld [vmem:[%s7304_s1 + $0x488] sm:$0xf]  ;;  %v4522_v47 = vld [vmem:[%s7304_s1 + $0x494] sm:$0xf0]  ;;  %v3890_v34 = vor.u32 %v4590_v40, %v3889_v30  ;;  %v4018_v45 = vor.u32 %v4622_v18, %v4017_v17 }
  0xc2   :  { %2113 = vmatpush.bf16.msra.mxu0 %v3042_v19  ;;  %v3762_v19 = vor.u32 %v4558_v12, %v3761_v11  ;;  %v3745_v25 = vld [vmem:[%s7304_s1 + $0x588] sm:$0xf]  ;;  %v3618_v36 = vor.u32 %v4522_v47, %v3617_v33  ;;  %v4618_v10 = vld [vmem:[%s7304_s1 + $0x794] sm:$0xf0] }
  0xc3   :  { %v3873_v52 = vld [vmem:[%s7304_s1 + $0x688] sm:$0xf]  ;;  %v4582_v41 = vld [vmem:[%s7304_s1 + $0x674] sm:$0xf0] }
  0xc4   :  { %2139 = vmatpush.bf16.msra.mxu2 %v3298_v54  ;;  %v4001_v50 = vld [vmem:[%s7304_s1 + $0x788] sm:$0xf]  ;;  %v3874_v3 = vor.u32 %v4586_v37, %v3873_v52  ;;  %v4614_v57 = vld [vmem:[%s7304_s1 + $0x774] sm:$0xf0] }
  0xc5   :  { %2126 = vmatpush.bf16.msra.mxu1 %v3170_v51  ;;  %2152 = vmatpush.bf16.msra.mxu3 %v3426_v13  ;;  %v3601_v56 = vld [vmem:[%s7304_s1 + $0x468] sm:$0xf]  ;;  %v4518_v51 = vld [vmem:[%s7304_s1 + $0x474] sm:$0xf0]  ;;  %v4002_v0 = vor.u32 %v4618_v10, %v4001_v50 }
  0xc6   :  { %2158 = vmatpush.bf16.msrb.mxu0 %v3666_v31  ;;  %v4554_v31 = vld [vmem:[%s7304_s1 + $0x594] sm:$0xf0]  ;;  %v3729_v13 = vld [vmem:[%s7304_s1 + $0x568] sm:$0xf] }
  0xc7   :  { %2140 = vmatmul.bf16.vlgmr.msra.gmra.mxu2 %v5468_v22  ;;  %2114 = vmatmul.bf16.vlgmr.msra.gmra.mxu0 %v5482_v27  ;;  %v3746_v54 = vor.u32 %v4554_v31, %v3745_v25  ;;  %v3985_v24 = vld [vmem:[%s7304_s1 + $0x768] sm:$0xf]  ;;  %v4514_v9 = vld [vmem:[%s7304_s1 + $0x454] sm:$0xf0] }
  0xc8   :  { %2184 = vmatpush.bf16.msrb.mxu2 %v3922_v38  ;;  %2153 = vmatmul.bf16.vlgmr.msra.gmra.mxu3 %v5522_v15  ;;  %v3857_v38 = vld [vmem:[%s7304_s1 + $0x668] sm:$0xf]  ;;  %v3986_v14 = vor.u32 %v4614_v57, %v3985_v24  ;;  %v4578_v11 = vld [vmem:[%s7304_s1 + $0x654] sm:$0xf0]  ;;  %v4436_v57 = vld [vmem:[%s7304_s1 + $0x1ec] sm:$0xf] }
  0xc9   :  { %2171 = vmatpush.bf16.msrb.mxu1 %v3794_v48  ;;  %2197 = vmatpush.bf16.msrb.mxu3 %v4050_v43  ;;  %v4550_v48 = vld [vmem:[%s7304_s1 + $0x574] sm:$0xf0]  ;;  %v3602_v43 = vor.u32 %v4518_v51, %v3601_v56  ;;  %v3858_v23 = vor.u32 %v4582_v41, %v3857_v38  ;;  %v3713_v35 = vld [vmem:[%s7304_s1 + $0x548] sm:$0xf]  ;;  %v4404_v51 = vld [vmem:[%s7304_s1 + $0xec] sm:$0xf] }
  0xca   :  { %2159 = vmatpush.bf16.msrb.mxu0 %v3650_v42  ;;  %2127 = vmatmul.bf16.vlgmr.msra.gmra.mxu1 %v5608_v8  ;;  %v3585_v42 = vld [vmem:[%s7304_s1 + $0x448] sm:$0xf]  ;;  %v3730_v21 = vor.u32 %v4550_v48, %v3729_v13  ;;  %v4610_v30 = vld [vmem:[%s7304_s1 + $0x754] sm:$0xf0] }
  0xcb   :  { %v3969_v12 = vld [vmem:[%s7304_s1 + $0x748] sm:$0xf]  ;;  %v4510_v40 = vld [vmem:[%s7304_s1 + $0x434] sm:$0xf0] }
  0xcc   :  { %2185 = vmatpush.bf16.msrb.mxu2 %v3906_v6  ;;  %v3841_v6 = vld [vmem:[%s7304_s1 + $0x648] sm:$0xf]  ;;  %v3970_v33 = vor.u32 %v4610_v30, %v3969_v12  ;;  %v4574_v25 = vld [vmem:[%s7304_s1 + $0x634] sm:$0xf0]  ;;  %v6414_v12 = vld [vmem:[%s7305_s2] sm:$0xf] }
  0xcd   :  { %2172 = vmatpush.bf16.msrb.mxu1 %v3778_v60  ;;  %2198 = vmatpush.bf16.msrb.mxu3 %v4034_v7  ;;  %v4546_v60 = vld [vmem:[%s7304_s1 + $0x554] sm:$0xf0]  ;;  %v3586_v7 = vor.u32 %v4514_v9, %v3585_v42  ;;  %v3842_v18 = vor.u32 %v4578_v11, %v3841_v6  ;;  %v3697_v47 = vld [vmem:[%s7304_s1 + $0x528] sm:$0xf]  ;;  %v3283_v9 = vld [vmem:[%s7304_s1 + $0x1f8] sm:$0xf0] }
  0xce   :  { %2160 = vmatpush.bf16.msrb.mxu0 %v3634_v62  ;;  %v3569_v62 = vld [vmem:[%s7304_s1 + $0x428] sm:$0xf]  ;;  %v3714_v17 = vor.u32 %v4546_v60, %v3713_v35  ;;  %v4606_v52 = vld [vmem:[%s7304_s1 + $0x734] sm:$0xf0]  ;;  %v4500_v60 = vld [vmem:[%s7304_s1 + $0x3ec] sm:$0xf]  ;;  %v3286_v30 = vor.u32 %v4436_v57, %v3283_v9 }
  0xcf   :  { %v3953_v31 = vld [vmem:[%s7304_s1 + $0x728] sm:$0xf]  ;;  %v4506_v50 = vld [vmem:[%s7304_s1 + $0x414] sm:$0xf0]  ;;  %v3539_v6 = vld [vmem:[%s7304_s1 + $0x3f8] sm:$0xf0] }
  0xd0   :  { %2186 = vmatpush.bf16.msrb.mxu2 %v3890_v34  ;;  %v3825_v34 = vld [vmem:[%s7304_s1 + $0x628] sm:$0xf]  ;;  %v4538_v13 = vld [vmem:[%s7304_s1 + $0x514] sm:$0xf0] }
  0xd1   :  { %2173 = vmatpush.bf16.msrb.mxu1 %v3762_v19  ;;  %2199 = vmatpush.bf16.msrb.mxu3 %v4018_v45  ;;  %v4542_v19 = vld [vmem:[%s7304_s1 + $0x534] sm:$0xf0]  ;;  %v3570_v45 = vor.u32 %v4510_v40, %v3569_v62  ;;  %v3553_v37 = vld [vmem:[%s7304_s1 + $0x408] sm:$0xf]  ;;  %v4400_v40 = vld [vmem:[%s7304_s1 + $0xcc] sm:$0xf] }
  0xd2   :  { %2161 = vmatpush.bf16.msrb.mxu0 %v3618_v36  ;;  %v3698_v10 = vor.u32 %v4542_v19, %v3697_v47  ;;  %v3681_v56 = vld [vmem:[%s7304_s1 + $0x508] sm:$0xf]  ;;  %v4570_v38 = vld [vmem:[%s7304_s1 + $0x614] sm:$0xf0]  ;;  %v3542_v47 = vor.u32 %v4500_v60, %v3539_v6  ;;  %v3267_v19 = vld [vmem:[%s7304_s1 + $0x1d8] sm:$0xf0] }
  0xd3   :  { %v3809_v48 = vld [vmem:[%s7304_s1 + $0x608] sm:$0xf]  ;;  %v4602_v24 = vld [vmem:[%s7304_s1 + $0x714] sm:$0xf0]  ;;  %v3682_v35 = vor.u32 %v4538_v13, %v3681_v56  ;;  %v3251_v13 = vld [vmem:[%s7304_s1 + $0x1b8] sm:$0xf0] }
  0xd4   :  { %2187 = vmatpush.bf16.msrb.mxu2 %v3874_v3  ;;  %v6359_v36 = vpop.f32.mrf.mxu0  ;;  %v3826_v3 = vor.u32 %v4574_v25, %v3825_v34  ;;  %v3937_v41 = vld [vmem:[%s7304_s1 + $0x708] sm:$0xf]  ;;  %v4464_v34 = vld [vmem:[%s7304_s1 + $0x2cc] sm:$0xf]  ;;  %v3235_v6 = vld [vmem:[%s7304_s1 + $0x198] sm:$0xf0] }
  0xd5   :  { %2174 = vmatpush.bf16.msrb.mxu1 %v3746_v54  ;;  %2200 = vmatpush.bf16.msrb.mxu3 %v4002_v0  ;;  %v3155_v54 = vld [vmem:[%s7304_s1 + $0xf8] sm:$0xf0]  ;;  %v3954_v0 = vor.u32 %v4606_v52, %v3953_v31  ;;  %v3938_v11 = vor.u32 %v4602_v24, %v3937_v41  ;;  %v4496_v31 = vld [vmem:[%s7304_s1 + $0x3cc] sm:$0xf] }
  0xd6   :  { %2162 = vmatpush.bf16.msrb.mxu0 %v3602_v43  ;;  %v3554_v43 = vor.u32 %v4506_v50, %v3553_v37  ;;  %v3158_v42 = vor.u32 %v4404_v51, %v3155_v54  ;;  %v3523_v52 = vld [vmem:[%s7304_s1 + $0x3d8] sm:$0xf0]  ;;  %v554_v37 = vperm.slane %v6414_v12, 0  ;;  %v4396_v51 = vld [vmem:[%s7304_s1 + $0xac] sm:$0xf] }
  0xd7   :  { %v3123_v54 = vld [vmem:[%s7304_s1 + $0xb8] sm:$0xf0]  ;;  %v4492_v41 = vld [vmem:[%s7304_s1 + $0x3ac] sm:$0xf] }
  0xd8   :  { %2188 = vmatpush.bf16.msrb.mxu2 %v3858_v23  ;;  %v3411_v23 = vld [vmem:[%s7304_s1 + $0x2f8] sm:$0xf0]  ;;  %v1908_v57 = vadd.f32 %v6359_v36, %v554_v37  ;;  %v4424_v36 = vld [vmem:[%s7304_s1 + $0x18c] sm:$0xf] }
  0xd9   :  { %2175 = vmatpush.bf16.msrb.mxu1 %v3730_v21  ;;  %2201 = vmatpush.bf16.msrb.mxu3 %v3986_v14  ;;  %v4468_v21 = vld [vmem:[%s7304_s1 + $0x2ec] sm:$0xf]  ;;  %v6403_v14 = vpop.f32.mrf.mxu2  ;;  %v3507_v24 = vld [vmem:[%s7304_s1 + $0x3b8] sm:$0xf0] }
  0xda   :  { %2163 = vmatpush.bf16.msrb.mxu0 %v3586_v7  ;;  %v3810_v7 = vor.u32 %v4570_v38, %v3809_v48  ;;  %v3414_v62 = vor.u32 %v4468_v21, %v3411_v23  ;;  %v4460_v48 = vld [vmem:[%s7304_s1 + $0x2ac] sm:$0xf]  ;;  %v3379_v38 = vld [vmem:[%s7304_s1 + $0x2b8] sm:$0xf0]  ;;  %v3510_v60 = vor.u32 %v4492_v41, %v3507_v24 }
  0xdb   :  { %v3382_v21 = vor.u32 %v4460_v48, %v3379_v38  ;;  %v4392_v23 = vld [vmem:[%s7304_s1 + $0x8c] sm:$0xf]  ;;  %v3075_v38 = vld [vmem:[%s7304_s1 + $0x58] sm:$0xf0] }
  0xdc   :  { %2189 = vmatpush.bf16.msrb.mxu2 %v3842_v18  ;;  %v4432_v18 = vld [vmem:[%s7304_s1 + $0x1cc] sm:$0xf]  ;;  %v3203_v41 = vld [vmem:[%s7304_s1 + $0x158] sm:$0xf0] }
  0xdd   :  { %2176 = vmatpush.bf16.msrb.mxu1 %v3714_v17  ;;  %2202 = vmatpush.bf16.msrb.mxu3 %v3970_v33  ;;  %v3139_v17 = vld [vmem:[%s7304_s1 + $0xd8] sm:$0xf0]  ;;  %v1909_v33 = vpop.f32.mrf.mxu0  ;;  %v6434_v25 = vpop.f32.mrf.mxu3  ;;  %v4384_v48 = vld [vmem:[%s7304_s1 + $0x4c] sm:$0xf] }
  0xde   :  { %2164 = vmatpush.bf16.msrb.mxu0 %v3570_v45  ;;  %v3395_v45 = vld [vmem:[%s7304_s1 + $0x2d8] sm:$0xf0]  ;;  %v3142_v50 = vor.u32 %v4400_v40, %v3139_v17  ;;  %v4488_v40 = vld [vmem:[%s7304_s1 + $0x38c] sm:$0xf] }
  0xdf   :  { %v3398_v56 = vor.u32 %v4464_v34, %v3395_v45  ;;  %v3491_v17 = vld [vmem:[%s7304_s1 + $0x398] sm:$0xf0]  ;;  %v4388_v34 = vld [vmem:[%s7304_s1 + $0x6c] sm:$0xf] }
  0xe0   :  { %2190 = vmatpush.bf16.msrb.mxu2 %v3826_v3  ;;  %v4428_v3 = vld [vmem:[%s7304_s1 + $0x1ac] sm:$0xf]  ;;  %v3091_v45 = vld [vmem:[%s7304_s1 + $0x78] sm:$0xf0]  ;;  %v3494_v37 = vor.u32 %v4488_v40, %v3491_v17 }
  0xe1   :  { %2177 = vmatpush.bf16.msrb.mxu1 %v3698_v10  ;;  %2203 = vmatpush.bf16.msrb.mxu3 %v3954_v0  ;;  %v3270_v10 = vor.u32 %v4432_v18, %v3267_v19  ;;  %v3526_v0 = vor.u32 %v4496_v31, %v3523_v52  ;;  %v3254_v9 = vor.u32 %v4428_v3, %v3251_v13  ;;  %v4420_v31 = vld [vmem:[%s7304_s1 + $0x16c] sm:$0xf]  ;;  %v3315_v40 = vld [vmem:[%s7304_s1 + $0x238] sm:$0xf0] }
  0xe2   :  { %2165 = vmatpush.bf16.msrb.mxu0 %v3554_v43  ;;  %v1935_v43 = vpop.f32.mrf.mxu2  ;;  %v3094_v3 = vor.u32 %v4388_v34, %v3091_v45  ;;  %v4448_v24 = vld [vmem:[%s7304_s1 + $0x24c] sm:$0xf] }
  0xe3   :  { %v4416_v43 = vld [vmem:[%s7304_s1 + $0x14c] sm:$0xf] }
  0xe4   :  { %2191 = vmatpush.bf16.msrb.mxu2 %v3810_v7  ;;  %v4456_v7 = vld [vmem:[%s7304_s1 + $0x28c] sm:$0xf] }
  0xe5   :  { %2178 = vmatpush.bf16.msrb.mxu1 %v3682_v35  ;;  %2204 = vmatpush.bf16.msrb.mxu3 %v3938_v11  ;;  %v3107_v35 = vld [vmem:[%s7304_s1 + $0x98] sm:$0xf0]  ;;  %v4476_v17 = vld [vmem:[%s7304_s1 + $0x32c] sm:$0xf] }
  0xe6   :  { %2210 = vmatpush.bf16.msra.mxu0 %v3158_v42  ;;  %v3126_v42 = vor.u32 %v4396_v51, %v3123_v54  ;;  %v3363_v11 = vld [vmem:[%s7304_s1 + $0x298] sm:$0xf0]  ;;  %v3110_v33 = vor.u32 %v4392_v23, %v3107_v35  ;;  %v4484_v51 = vld [vmem:[%s7304_s1 + $0x36c] sm:$0xf]  ;;  %v3078_v23 = vor.u32 %v4384_v48, %v3075_v38  ;;  %v3206_v35 = vor.u32 %v4416_v43, %v3203_v41 }
  0xe7   :  { %2166 = vmatmul.bf16.vlgmr.msrb.gmra.mxu0 %v5706_v26  ;;  %2192 = vmatmul.bf16.vlgmr.msrb.gmra.mxu2 %v5664_v59  ;;  %v3366_v19 = vor.u32 %v4456_v7, %v3363_v11  ;;  %v4412_v7 = vld [vmem:[%s7304_s1 + $0x12c] sm:$0xf]  ;;  %v3795_v43 = vld [vmem:[%s7304_s1 + $0x5f8] sm:$0xf0] }
  0xe8   :  { %2236 = vmatpush.bf16.msra.mxu2 %v3414_v62  ;;  %2205 = vmatmul.bf16.vlgmr.msrb.gmra.mxu3 %v5748_v5  ;;  %v1920_v62 = vpop.f32.mrf.mxu1  ;;  %v3923_v41 = vld [vmem:[%s7304_s1 + $0x6f8] sm:$0xf0] }
  0xe9   :  { %2223 = vmatpush.bf16.msra.mxu1 %v3286_v30  ;;  %2249 = vmatpush.bf16.msra.mxu3 %v3542_v47  ;;  %v1948_v30 = vpop.f32.mrf.mxu3  ;;  %v1921_v18 = vadd.f32 %v1920_v62, %v1908_v57  ;;  %v3238_v47 = vor.u32 %v4424_v36, %v3235_v6  ;;  %v3331_v57 = vld [vmem:[%s7304_s1 + $0x258] sm:$0xf0]  ;;  %v4444_v62 = vld [vmem:[%s7304_s1 + $0x22c] sm:$0xf] }
  0xea   :  { %2211 = vmatpush.bf16.msra.mxu0 %v3142_v50  ;;  %2179 = vmatmul.bf16.vlgmr.msrb.gmra.mxu1 %v5822_v61  ;;  %v3219_v50 = vld [vmem:[%s7304_s1 + $0x178] sm:$0xf0]  ;;  %v3334_v36 = vor.u32 %v4448_v24, %v3331_v57  ;;  %v3318_v45 = vor.u32 %v4444_v62, %v3315_v40  ;;  %v4592_v62 = vld [vmem:[%s7304_s1 + $0x6cc] sm:$0xf] }
  0xeb   :  { %v1934_v52 = vadd.f32 %v6403_v14, %v1921_v18  ;;  %v3475_v14 = vld [vmem:[%s7304_s1 + $0x378] sm:$0xf0] }
  0xec   :  { %2237 = vmatpush.bf16.msra.mxu2 %v3398_v56  ;;  %v3347_v56 = vld [vmem:[%s7304_s1 + $0x278] sm:$0xf0] }
  0xed   :  { %2224 = vmatpush.bf16.msra.mxu1 %v3270_v10  ;;  %2250 = vmatpush.bf16.msra.mxu3 %v3526_v0  ;;  %v4452_v10 = vld [vmem:[%s7304_s1 + $0x26c] sm:$0xf]  ;;  %v6522_v54 = vadd.f32 %v6434_v25, %v1934_v52  ;;  %v3222_v0 = vor.u32 %v4420_v31, %v3219_v50  ;;  %v3478_v25 = vor.u32 %v4484_v51, %v3475_v14  ;;  %v3059_v6 = vld [vmem:[%s7304_s1 + $0x38] sm:$0xf0] }
  0xee   :  { %2212 = vmatpush.bf16.msra.mxu0 %v3126_v42  ;;  %v3350_v13 = vor.u32 %v4452_v10, %v3347_v56  ;;  %v3187_v30 = vld [vmem:[%s7304_s1 + $0x138] sm:$0xf0]  ;;  %v4408_v31 = vld [vmem:[%s7304_s1 + $0x10c] sm:$0xf] }
  0xef   :  { %v3443_v18 = vld [vmem:[%s7304_s1 + $0x338] sm:$0xf0]  ;;  %v3190_v34 = vor.u32 %v4412_v7, %v3187_v30  ;;  %v4472_v51 = vld [vmem:[%s7304_s1 + $0x30c] sm:$0xf] }
  0xf0   :  { %2238 = vmatpush.bf16.msra.mxu2 %v3382_v21  ;;  %v1922_v42 = vpop.f32.mrf.mxu1  ;;  %v3459_v21 = vld [vmem:[%s7304_s1 + $0x358] sm:$0xf0]  ;;  %v3446_v10 = vor.u32 %v4476_v17, %v3443_v18  ;;  %v4560_v7 = vld [vmem:[%s7304_s1 + $0x5cc] sm:$0xf] }
  0xf1   :  { %2225 = vmatpush.bf16.msra.mxu1 %v3254_v9  ;;  %2251 = vmatpush.bf16.msra.mxu3 %v3510_v60  ;;  %v4480_v9 = vld [vmem:[%s7304_s1 + $0x34c] sm:$0xf]  ;;  %v3171_v52 = vld [vmem:[%s7304_s1 + $0x118] sm:$0xf0] }
  0xf2   :  { %2213 = vmatpush.bf16.msra.mxu0 %v3110_v33  ;;  %v4380_v60 = vld [vmem:[%s7304_s1 + $0x2c] sm:$0xf]  ;;  %v3462_v11 = vor.u32 %v4480_v9, %v3459_v21  ;;  %v3299_v56 = vld [vmem:[%s7304_s1 + $0x218] sm:$0xf0]  ;;  %v3174_v24 = vor.u32 %v4408_v31, %v3171_v52 }
  0xf3   :  { %v3062_v33 = vor.u32 %v4380_v60, %v3059_v6  ;;  %v6587_v50 = vpop.f32.mrf.mxu0  ;;  %v3427_v14 = vld [vmem:[%s7304_s1 + $0x318] sm:$0xf0]  ;;  %v4628_v42 = vld [vmem:[%s7304_s1 + $0x7ec] sm:$0xf] }
  0xf4   :  { %2239 = vmatpush.bf16.msra.mxu2 %v3366_v19  ;;  %v3043_v19 = vld [vmem:[%s7304_s1 + $0x18] sm:$0xf0]  ;;  %v3430_v21 = vor.u32 %v4472_v51, %v3427_v14  ;;  %v4528_v60 = vld [vmem:[%s7304_s1 + $0x4cc] sm:$0xf] }
  0xf5   :  { %2226 = vmatpush.bf16.msra.mxu1 %v3238_v47  ;;  %2252 = vmatpush.bf16.msra.mxu3 %v3494_v37  ;;  %v4376_v47 = vld [vmem:[%s7304_s1 + $0xc] sm:$0xf]  ;;  %v6607_v48 = vpop.f32.mrf.mxu2  ;;  %v4051_v9 = vld [vmem:[%s7304_s1 + $0x7f8] sm:$0xf0] }
  0xf6   :  { %2214 = vmatpush.bf16.msra.mxu0 %v3094_v3  ;;  %v4440_v37 = vld [vmem:[%s7304_s1 + $0x20c] sm:$0xf]  ;;  %v3046_v38 = vor.u32 %v4376_v47, %v3043_v19  ;;  %v3651_v6 = vld [vmem:[%s7304_s1 + $0x4d8] sm:$0xf0] }
  0xf7   :  { %v4532_v3 = vld [vmem:[%s7304_s1 + $0x4ec] sm:$0xf]  ;;  %v3302_v57 = vor.u32 %v4440_v37, %v3299_v56  ;;  %v3779_v30 = vld [vmem:[%s7304_s1 + $0x5d8] sm:$0xf0] }
  0xf8   :  { %2240 = vmatpush.bf16.msra.mxu2 %v3350_v13  ;;  %v4564_v13 = vld [vmem:[%s7304_s1 + $0x5ec] sm:$0xf]  ;;  %v3907_v40 = vld [vmem:[%s7304_s1 + $0x6d8] sm:$0xf0]  ;;  %v3782_v19 = vor.u32 %v4560_v7, %v3779_v30 }
  0xf9   :  { %2227 = vmatpush.bf16.msra.mxu1 %v3222_v0  ;;  %2253 = vmatpush.bf16.msra.mxu3 %v3478_v25  ;;  %v3667_v0 = vld [vmem:[%s7304_s1 + $0x4f8] sm:$0xf0]  ;;  %v4596_v25 = vld [vmem:[%s7304_s1 + $0x6ec] sm:$0xf] }
  0xfa   :  { %2215 = vmatpush.bf16.msra.mxu0 %v3078_v23  ;;  %v3670_v23 = vor.u32 %v4532_v3, %v3667_v0  ;;  %v4624_v17 = vld [vmem:[%s7304_s1 + $0x7cc] sm:$0xf]  ;;  %v4035_v18 = vld [vmem:[%s7304_s1 + $0x7d8] sm:$0xf0] }
  0xfb   :  { %v1961_v47 = vpop.f32.mrf.mxu0  ;;  %v3635_v31 = vld [vmem:[%s7304_s1 + $0x4b8] sm:$0xf0]  ;;  %v4556_v52 = vld [vmem:[%s7304_s1 + $0x5ac] sm:$0xf]  ;;  %v4038_v37 = vor.u32 %v4624_v17, %v4035_v18 }
  0xfc   :  { %2241 = vmatpush.bf16.msra.mxu2 %v3334_v36  ;;  %v3926_v36 = vor.u32 %v4596_v25, %v3923_v41  ;;  %v4588_v56 = vld [vmem:[%s7304_s1 + $0x6ac] sm:$0xf]  ;;  %v3891_v51 = vld [vmem:[%s7304_s1 + $0x6b8] sm:$0xf0] }
  0xfd   :  { %2228 = vmatpush.bf16.msra.mxu1 %v3206_v35  ;;  %2254 = vmatpush.bf16.msra.mxu3 %v3462_v11  ;;  %v3798_v35 = vor.u32 %v4564_v13, %v3795_v43  ;;  %v4054_v11 = vor.u32 %v4628_v42, %v4051_v9  ;;  %v1987_v14 = vpop.f32.mrf.mxu2  ;;  %v4620_v0 = vld [vmem:[%s7304_s1 + $0x7ac] sm:$0xf]  ;;  %v3894_v43 = vor.u32 %v4588_v56, %v3891_v51  ;;  %v3619_v41 = vld [vmem:[%s7304_s1 + $0x498] sm:$0xf0] }
  0xfe   :  { %2216 = vmatpush.bf16.msra.mxu0 %v3062_v33  ;;  %v3654_v33 = vor.u32 %v4528_v60, %v3651_v6  ;;  %v4520_v25 = vld [vmem:[%s7304_s1 + $0x48c] sm:$0xf]  ;;  %v3875_v42 = vld [vmem:[%s7304_s1 + $0x698] sm:$0xf0] }
  0xff   :  { %v6667_v3 = vpop.f32.mrf.mxu3  ;;  %v4616_v9 = vld [vmem:[%s7304_s1 + $0x78c] sm:$0xf]  ;;  %v3603_v6 = vld [vmem:[%s7304_s1 + $0x478] sm:$0xf0] }
 0x100   :  { %2242 = vmatpush.bf16.msra.mxu2 %v3318_v45  ;;  %v4524_v45 = vld [vmem:[%s7304_s1 + $0x4ac] sm:$0xf]  ;;  %v3731_v30 = vld [vmem:[%s7304_s1 + $0x578] sm:$0xf0] }
 0x101   :  { %2229 = vmatpush.bf16.msra.mxu1 %v3190_v34  ;;  %2255 = vmatpush.bf16.msra.mxu3 %v3446_v10  ;;  %v3910_v34 = vor.u32 %v4592_v62, %v3907_v40  ;;  %v3763_v10 = vld [vmem:[%s7304_s1 + $0x5b8] sm:$0xf0]  ;;  %v3638_v13 = vor.u32 %v4524_v45, %v3635_v31  ;;  %v4516_v60 = vld [vmem:[%s7304_s1 + $0x46c] sm:$0xf] }
 0x102   :  { %2217 = vmatpush.bf16.msra.mxu0 %v3046_v38  ;;  %v3766_v38 = vor.u32 %v4556_v52, %v3763_v10  ;;  %v4548_v7 = vld [vmem:[%s7304_s1 + $0x56c] sm:$0xf]  ;;  %v3859_v40 = vld [vmem:[%s7304_s1 + $0x678] sm:$0xf0] }
 0x103   :  { %v4580_v62 = vld [vmem:[%s7304_s1 + $0x66c] sm:$0xf]  ;;  %v3587_v52 = vld [vmem:[%s7304_s1 + $0x458] sm:$0xf0] }
 0x104   :  { %2243 = vmatpush.bf16.msra.mxu2 %v3302_v57  ;;  %v4584_v57 = vld [vmem:[%s7304_s1 + $0x68c] sm:$0xf]  ;;  %v6722_v17 = vpop.f32.mrf.mxu0  ;;  %v3862_v45 = vor.u32 %v4580_v62, %v3859_v40  ;;  %v3715_v51 = vld [vmem:[%s7304_s1 + $0x558] sm:$0xf0] }
 0x105   :  { %2230 = vmatpush.bf16.msra.mxu1 %v3174_v24  ;;  %2256 = vmatpush.bf16.msra.mxu3 %v3430_v21  ;;  %v3747_v24 = vld [vmem:[%s7304_s1 + $0x598] sm:$0xf0]  ;;  %v4612_v18 = vld [vmem:[%s7304_s1 + $0x76c] sm:$0xf] }
 0x106   :  { %2262 = vmatpush.bf16.msrb.mxu0 %v3670_v23  ;;  %v4003_v21 = vld [vmem:[%s7304_s1 + $0x798] sm:$0xf0]  ;;  %v3622_v23 = vor.u32 %v4520_v25, %v3619_v41  ;;  %v4512_v31 = vld [vmem:[%s7304_s1 + $0x44c] sm:$0xf] }
 0x107   :  { %2244 = vmatmul.bf16.vlgmr.msra.gmra.mxu2 %v5468_v22  ;;  %v4019_v22 = vld [vmem:[%s7304_s1 + $0x7b8] sm:$0xf0]  ;;  %2218 = vmatmul.bf16.vlgmr.msra.gmra.mxu0 %v5482_v27  ;;  %v4552_v27 = vld [vmem:[%s7304_s1 + $0x58c] sm:$0xf]  ;;  %v2000_v47 = vpop.f32.mrf.mxu3 }
 0x108   :  { %2288 = vmatpush.bf16.msrb.mxu2 %v3926_v36  ;;  %2257 = vmatmul.bf16.vlgmr.msra.gmra.mxu3 %v5522_v15  ;;  %v6687_v15 = vpop.f32.mrf.mxu1  ;;  %v3878_v36 = vor.u32 %v4584_v57, %v3875_v42  ;;  %v4576_v14 = vld [vmem:[%s7304_s1 + $0x64c] sm:$0xf]  ;;  %v3699_v42 = vld [vmem:[%s7304_s1 + $0x538] sm:$0xf0] }
 0x109   :  { %2275 = vmatpush.bf16.msrb.mxu1 %v3798_v35  ;;  %2301 = vmatpush.bf16.msrb.mxu3 %v4054_v11  ;;  %v3750_v35 = vor.u32 %v4552_v27, %v3747_v24  ;;  %v4006_v11 = vor.u32 %v4616_v9, %v4003_v21  ;;  %v4508_v27 = vld [vmem:[%s7304_s1 + $0x42c] sm:$0xf]  ;;  %v3827_v21 = vld [vmem:[%s7304_s1 + $0x638] sm:$0xf0] }
 0x10a   :  { %2263 = vmatpush.bf16.msrb.mxu0 %v3654_v33  ;;  %2231 = vmatmul.bf16.vlgmr.msra.gmra.mxu1 %v5608_v8  ;;  %v4022_v8 = vor.u32 %v4620_v0, %v4019_v22  ;;  %v3987_v33 = vld [vmem:[%s7304_s1 + $0x778] sm:$0xf0]  ;;  %v4608_v22 = vld [vmem:[%s7304_s1 + $0x74c] sm:$0xf] }
 0x10b   :  { %v3990_v56 = vor.u32 %v4612_v18, %v3987_v33  ;;  %v3843_v0 = vld [vmem:[%s7304_s1 + $0x658] sm:$0xf0]  ;;  %v4540_v24 = vld [vmem:[%s7304_s1 + $0x52c] sm:$0xf] }
 0x10c   :  { %2289 = vmatpush.bf16.msrb.mxu2 %v3910_v34  ;;  %v3734_v34 = vor.u32 %v4548_v7, %v3731_v30  ;;  %v3846_v41 = vor.u32 %v4576_v14, %v3843_v0  ;;  %v4572_v9 = vld [vmem:[%s7304_s1 + $0x62c] sm:$0xf]  ;;  %v3702_v30 = vor.u32 %v4540_v24, %v3699_v42  ;;  %v3683_v18 = vld [vmem:[%s7304_s1 + $0x518] sm:$0xf0]  ;;  %v4177_v14 = vld [vmem:[%s7306_s3 + $0xf0] sm:$0xf] }
 0x10d   :  { %2276 = vmatpush.bf16.msrb.mxu1 %v3782_v19  ;;  %2302 = vmatpush.bf16.msrb.mxu3 %v4038_v37  ;;  %v3606_v19 = vor.u32 %v4516_v60, %v3603_v6  ;;  %v4544_v37 = vld [vmem:[%s7304_s1 + $0x54c] sm:$0xf]  ;;  %v3830_v62 = vor.u32 %v4572_v9, %v3827_v21  ;;  %v4662_v0 = vld [vmem:[%s7306_s3 + $0xf4] sm:$0xf0]  ;;  %v4644_v24 = vld [vmem:[%s7306_s3 + $0x64] sm:$0xf0] }
 0x10e   :  { %2264 = vmatpush.bf16.msrb.mxu0 %v3638_v13  ;;  %v3971_v13 = vld [vmem:[%s7304_s1 + $0x758] sm:$0xf0]  ;;  %v3718_v25 = vor.u32 %v4544_v37, %v3715_v51  ;;  %v4504_v7 = vld [vmem:[%s7304_s1 + $0x40c] sm:$0xf]  ;;  %v4113_v37 = vld [vmem:[%s7306_s3 + $0x70] sm:$0xf] }
 0x10f   :  { %v3974_v57 = vor.u32 %v4608_v22, %v3971_v13  ;;  %v6780_v60 = vpop.f32.mrf.mxu3  ;;  %v4536_v40 = vld [vmem:[%s7304_s1 + $0x50c] sm:$0xf]  ;;  %v4169_v42 = vld [vmem:[%s7306_s3 + $0xe0] sm:$0xf]  ;;  %v4660_v9 = vld [vmem:[%s7306_s3 + $0xe4] sm:$0xf0] }
 0x110   :  { %2290 = vmatpush.bf16.msrb.mxu2 %v3894_v43  ;;  %v1974_v10 = vpop.f32.mrf.mxu1  ;;  %v3590_v43 = vor.u32 %v4512_v31, %v3587_v52  ;;  %v4568_v33 = vld [vmem:[%s7304_s1 + $0x60c] sm:$0xf]  ;;  %v3939_v52 = vld [vmem:[%s7304_s1 + $0x718] sm:$0xf0]  ;;  %v3686_v22 = vor.u32 %v4536_v40, %v3683_v18  ;;  %v4153_v40 = vld [vmem:[%s7306_s3 + $0xc0] sm:$0xf] }
 0x111   :  { %2277 = vmatpush.bf16.msrb.mxu1 %v3766_v38  ;;  %2303 = vmatpush.bf16.msrb.mxu3 %v4022_v8  ;;  %v6754_v38 = vpop.f32.mrf.mxu2  ;;  %v3571_v8 = vld [vmem:[%s7304_s1 + $0x438] sm:$0xf0]  ;;  %v4646_v10 = vld [vmem:[%s7306_s3 + $0x74] sm:$0xf0] }
 0x112   :  { %2265 = vmatpush.bf16.msrb.mxu0 %v3622_v23  ;;  %v2013_v23 = vpop.f32.mrf.mxu0  ;;  %v3574_v6 = vor.u32 %v4508_v27, %v3571_v8  ;;  %v4178_v27 = vor.u32 %v4662_v0, %v4177_v14  ;;  %v4105_v8 = vld [vmem:[%s7306_s3 + $0x60] sm:$0xf]  ;;  %v4678_v18 = vld [vmem:[%s7306_s3 + $0x174] sm:$0xf0] }
 0x114   :  { %2291 = vmatpush.bf16.msrb.mxu2 %v3878_v36  ;;  %v3955_v36 = vld [vmem:[%s7304_s1 + $0x738] sm:$0xf0] }
 0x115   :  { %2278 = vmatpush.bf16.msrb.mxu1 %v3750_v35  ;;  %2304 = vmatpush.bf16.msrb.mxu3 %v4006_v11  ;;  %v4604_v35 = vld [vmem:[%s7304_s1 + $0x72c] sm:$0xf]  ;;  %v3555_v11 = vld [vmem:[%s7304_s1 + $0x418] sm:$0xf0] }
 0x116   :  { %2266 = vmatpush.bf16.msrb.mxu0 %v3606_v19  ;;  %v3958_v47 = vor.u32 %v4604_v35, %v3955_v36  ;;  %v3811_v19 = vld [vmem:[%s7304_s1 + $0x618] sm:$0xf0]  ;;  %v3558_v51 = vor.u32 %v4504_v7, %v3555_v11  ;;  %v4170_v35 = vor.u32 %v4660_v9, %v4169_v42  ;;  %v4097_v36 = vld [vmem:[%s7306_s3 + $0x50] sm:$0xf] }
 0x117   :  { %v3814_v13 = vor.u32 %v4568_v33, %v3811_v19  ;;  %v4161_v7 = vld [vmem:[%s7306_s3 + $0xd0] sm:$0xf] }
 0x118   :  { %2292 = vmatpush.bf16.msrb.mxu2 %v3862_v45  ;;  %v555_v45 = vperm.slane %v6414_v12, 1  ;;  %v2024_v31 = vpop.f32.mrf.mxu1 }
 0x119   :  { %2279 = vmatpush.bf16.msrb.mxu1 %v3734_v34  ;;  %2305 = vmatpush.bf16.msrb.mxu3 %v3990_v56  ;;  %v4600_v34 = vld [vmem:[%s7304_s1 + $0x70c] sm:$0xf]  ;;  %v2039_v56 = vpop.f32.mrf.mxu2 }
 0x11a   :  { %2267 = vmatpush.bf16.msrb.mxu0 %v3590_v43  ;;  %v3942_v43 = vor.u32 %v4600_v34, %v3939_v52  ;;  %v4145_v52 = vld [vmem:[%s7306_s3 + $0xb0] sm:$0xf]  ;;  %v4233_v56 = vld [vmem:[%s7306_s3 + $0x160] sm:$0xf] }
 0x11c   :  { %2293 = vmatpush.bf16.msrb.mxu2 %v3846_v41  ;;  %v2012_v41 = vadd.f32 %v6722_v17, %v555_v45  ;;  %v4106_v17 = vor.u32 %v4644_v24, %v4105_v8  ;;  %v4081_v45 = vld [vmem:[%s7306_s3 + $0x30] sm:$0xf]  ;;  %v4652_v8 = vld [vmem:[%s7306_s3 + $0xa4] sm:$0xf0] }
 0x11d   :  { %2280 = vmatpush.bf16.msrb.mxu1 %v3718_v25  ;;  %2306 = vmatpush.bf16.msrb.mxu3 %v3974_v57  ;;  %v4114_v25 = vor.u32 %v4646_v10, %v4113_v37  ;;  %v2052_v57 = vpop.f32.mrf.mxu3 }
 0x11e   :  { %2268 = vmatpush.bf16.msrb.mxu0 %v3574_v6  ;;  %v2025_v21 = vadd.f32 %v2024_v31, %v2012_v41  ;;  %v4642_v6 = vld [vmem:[%s7306_s3 + $0x54] sm:$0xf0]  ;;  %v4636_v41 = vld [vmem:[%s7306_s3 + $0x24] sm:$0xf0] }
 0x11f   :  { %v4638_v31 = vld [vmem:[%s7306_s3 + $0x34] sm:$0xf0] }
 0x120   :  { %2294 = vmatpush.bf16.msrb.mxu2 %v3830_v62  ;;  %v2026_v23 = vpop.f32.mrf.mxu1  ;;  %v2038_v11 = vadd.f32 %v6754_v38, %v2025_v21  ;;  %v4241_v38 = vld [vmem:[%s7306_s3 + $0x170] sm:$0xf]  ;;  %v4082_v0 = vor.u32 %v4638_v31, %v4081_v45  ;;  %v4670_v45 = vld [vmem:[%s7306_s3 + $0x134] sm:$0xf0]  ;;  %v4661_v31 = vld [vmem:[%s7306_s3 + $0xf4] sm:$0xf] }
 0x121   :  { %2281 = vmatpush.bf16.msrb.mxu1 %v3702_v30  ;;  %2307 = vmatpush.bf16.msrb.mxu3 %v3958_v47  ;;  %v4098_v30 = vor.u32 %v4642_v6, %v4097_v36  ;;  %v4242_v33 = vor.u32 %v4678_v18, %v4241_v38  ;;  %v4634_v36 = vld [vmem:[%s7306_s3 + $0x14] sm:$0xf0]  ;;  %v4129_v6 = vld [vmem:[%s7306_s3 + $0x90] sm:$0xf] }
 0x122   :  { %2269 = vmatpush.bf16.msrb.mxu0 %v3558_v51  ;;  %v2051_v47 = vadd.f32 %v6780_v60, %v2038_v11  ;;  %v4654_v60 = vld [vmem:[%s7306_s3 + $0xb4] sm:$0xf0]  ;;  %v4676_v51 = vld [vmem:[%s7306_s3 + $0x164] sm:$0xf0]  ;;  %v4217_v11 = vld [vmem:[%s7306_s3 + $0x140] sm:$0xf] }
 0x123   :  { %v4234_v14 = vor.u32 %v4676_v51, %v4233_v56 }
 0x124   :  { %2295 = vmatpush.bf16.msrb.mxu2 %v3814_v13  ;;  %v2063_v37 = vpop.f32.mrf.mxu0  ;;  %v1960_v13 = vadd.f32 %v6587_v50, %v6522_v54  ;;  %v4225_v54 = vld [vmem:[%s7306_s3 + $0x150] sm:$0xf]  ;;  %v4674_v50 = vld [vmem:[%s7306_s3 + $0x154] sm:$0xf0] }
 0x125   :  { %2282 = vmatpush.bf16.msrb.mxu1 %v3686_v22  ;;  %2308 = vmatpush.bf16.msrb.mxu3 %v3942_v43  ;;  %v2064_v22 = vadd.f32 %v2063_v37, %v2051_v47  ;;  %v4146_v43 = vor.u32 %v4654_v60, %v4145_v52  ;;  %v4226_v57 = vor.u32 %v4674_v50, %v4225_v54  ;;  %v4648_v47 = vld [vmem:[%s7306_s3 + $0x84] sm:$0xf0]  ;;  %v4179_v52 = vld [vmem:[%s7306_s3 + $0xf8] sm:$0xf0] }
 0x126   :  { %2708 = vmatpush.bf16.msra.mxu0 %v4114_v25  ;;  %v4073_v25 = vld [vmem:[%s7306_s3 + $0x20] sm:$0xf]  ;;  %v1973_v21 = vadd.f32 %v6687_v15, %v1960_v13  ;;  %v4650_v15 = vld [vmem:[%s7306_s3 + $0x94] sm:$0xf0]  ;;  %v4643_v13 = vld [vmem:[%s7306_s3 + $0x64] sm:$0xf] }
 0x127   :  { %2270 = vmatmul.bf16.vlgmr.msrb.gmra.mxu0 %v5706_v26  ;;  %2296 = vmatmul.bf16.vlgmr.msrb.gmra.mxu2 %v5664_v59  ;;  %v4658_v26 = vld [vmem:[%s7306_s3 + $0xd4] sm:$0xf0]  ;;  %v4089_v59 = vld [vmem:[%s7306_s3 + $0x40] sm:$0xf]  ;;  %v4074_v42 = vor.u32 %v4636_v41, %v4073_v25  ;;  %v4130_v18 = vor.u32 %v4650_v15, %v4129_v6  ;;  %v4107_v25 = vld [vmem:[%s7306_s3 + $0x68] sm:$0xf0] }
 0x128   :  { %2283 = vmatmul.bf16.vlgmr.msrb.gmra.mxu1 %v5822_v61  ;;  %2309 = vmatmul.bf16.vlgmr.msrb.gmra.mxu3 %v5748_v5  ;;  %v4162_v62 = vor.u32 %v4658_v26, %v4161_v7  ;;  %v4640_v61 = vld [vmem:[%s7306_s3 + $0x44] sm:$0xf0]  ;;  %v2076_v10 = vpop.f32.mrf.mxu1  ;;  %v1986_v38 = vadd.f32 %v6607_v48, %v1973_v21  ;;  %v4209_v48 = vld [vmem:[%s7306_s3 + $0x130] sm:$0xf]  ;;  %v4201_v41 = vld [vmem:[%s7306_s3 + $0x120] sm:$0xf] }
 0x129   :  { %2721 = vmatpush.bf16.msra.mxu1 %v4178_v27  ;;  %v4656_v5 = vld [vmem:[%s7306_s3 + $0xc4] sm:$0xf0]  ;;  %v4090_v19 = vor.u32 %v4640_v61, %v4089_v59  ;;  %2734 = vmatpush.bf16.msra.mxu2 %v4242_v33  ;;  %v4137_v27 = vld [vmem:[%s7306_s3 + $0xa0] sm:$0xf]  ;;  %v2077_v9 = vadd.f32 %v2076_v10, %v2064_v22  ;;  %v4210_v60 = vor.u32 %v4670_v45, %v4209_v48  ;;  %v4641_v21 = vld [vmem:[%s7306_s3 + $0x54] sm:$0xf] }
 0x12a   :  { %2709 = vmatpush.bf16.msra.mxu0 %v4106_v17  ;;  %v4154_v34 = vor.u32 %v4656_v5, %v4153_v40  ;;  %v2089_v24 = vpop.f32.mrf.mxu2  ;;  %v4138_v23 = vor.u32 %v4652_v8, %v4137_v27  ;;  %v4057_v40 = vld [vmem:[%s7306_s3] sm:$0xf]  ;;  %v4632_v5 = vld [vmem:[%s7306_s3 + $0x4] sm:$0xf0]  ;;  %v4659_v27 = vld [vmem:[%s7306_s3 + $0xe4] sm:$0xf] }
 0x12b   :  { %v2102_v17 = vpop.f32.mrf.mxu3  ;;  %v2090_v59 = vadd.f32 %v2089_v24, %v2077_v9  ;;  %v4121_v33 = vld [vmem:[%s7306_s3 + $0x80] sm:$0xf]  ;;  %v4058_v56 = vor.u32 %v4632_v5, %v4057_v40  ;;  %v4171_v8 = vld [vmem:[%s7306_s3 + $0xe8] sm:$0xf0]  ;;  %v4666_v9 = vld [vmem:[%s7306_s3 + $0x114] sm:$0xf0] }
 0x12c   :  { %v2065_v7 = vpop.f32.mrf.mxu0  ;;  %v4163_v6 = vld [vmem:[%s7306_s3 + $0xd8] sm:$0xf0]  ;;  %v4664_v15 = vld [vmem:[%s7306_s3 + $0x104] sm:$0xf0]  ;;  %v4655_v5 = vld [vmem:[%s7306_s3 + $0xc4] sm:$0xf] }
 0x12d   :  { %2722 = vmatpush.bf16.msra.mxu1 %v4170_v35  ;;  %2735 = vmatpush.bf16.msra.mxu2 %v4234_v14  ;;  %v4065_v35 = vld [vmem:[%s7306_s3 + $0x10] sm:$0xf]  ;;  %v2103_v10 = vadd.f32 %v2102_v17, %v2090_v59  ;;  %v1999_v14 = vadd.f32 %v6667_v3, %v1986_v38  ;;  %v4668_v3 = vld [vmem:[%s7306_s3 + $0x124] sm:$0xf0]  ;;  %v4174_v17 = vor.u32 %v4659_v27, %v4171_v8  ;;  %v4185_v7 = vld [vmem:[%s7306_s3 + $0x100] sm:$0xf] }
 0x12e   :  { %2710 = vmatpush.bf16.msra.mxu0 %v4098_v30  ;;  %v4672_v30 = vld [vmem:[%s7306_s3 + $0x144] sm:$0xf0]  ;;  %v4066_v61 = vor.u32 %v4634_v36, %v4065_v35  ;;  %v4202_v54 = vor.u32 %v4668_v3, %v4201_v41  ;;  %v4657_v35 = vld [vmem:[%s7306_s3 + $0xd4] sm:$0xf]  ;;  %v4639_v59 = vld [vmem:[%s7306_s3 + $0x44] sm:$0xf]  ;;  %v4186_v40 = vor.u32 %v4664_v15, %v4185_v7 }
 0x12f   :  { %v6975_v50 = vpack.c.bf16 %v2103_v10, %v2103_v10  ;;  %v6977_v24 = vpack.c.bf16 %v1999_v14, %v1999_v14  ;;  %v4155_v38 = vld [vmem:[%s7306_s3 + $0xc8] sm:$0xf0]  ;;  %v4637_v48 = vld [vmem:[%s7306_s3 + $0x34] sm:$0xf]  ;;  %v4083_v45 = vld [vmem:[%s7306_s3 + $0x38] sm:$0xf0] }
 0x130   :  { %v2078_v26 = vpop.f32.mrf.mxu1  ;;  %v4086_v10 = vor.u32 %v4637_v48, %v4083_v45  ;;  %v4075_v14 = vld [vmem:[%s7306_s3 + $0x28] sm:$0xf0]  ;;  %v4669_v15 = vld [vmem:[%s7306_s3 + $0x134] sm:$0xf] }
 0x131   :  { %2723 = vmatpush.bf16.msra.mxu1 %v4162_v62  ;;  %2736 = vmatpush.bf16.msra.mxu2 %v4226_v57  ;;  %v4218_v62 = vor.u32 %v4672_v30, %v4217_v11  ;;  %v4110_v57 = vor.u32 %v4643_v13, %v4107_v25  ;;  %v4677_v26 = vld [vmem:[%s7306_s3 + $0x174] sm:$0xf]  ;;  %v4243_v11 = vld [vmem:[%s7306_s3 + $0x178] sm:$0xf0]  ;;  %v4139_v13 = vld [vmem:[%s7306_s3 + $0xa8] sm:$0xf0] }
 0x132   :  { %2711 = vmatpush.bf16.msra.mxu0 %v4090_v19  ;;  %v4645_v19 = vld [vmem:[%s7306_s3 + $0x74] sm:$0xf]  ;;  %v2091_v37 = vpop.f32.mrf.mxu2  ;;  %v4227_v25 = vld [vmem:[%s7306_s3 + $0x158] sm:$0xf0] }
 0x133   :  { %v2104_v51 = vpop.f32.mrf.mxu3 }
 0x134   :  { %v4635_v51 = vld [vmem:[%s7306_s3 + $0x24] sm:$0xf] }
 0x135   :  { %2724 = vmatpush.bf16.msra.mxu1 %v4154_v34  ;;  %2737 = vmatpush.bf16.msra.mxu2 %v4218_v62  ;;  %v4115_v34 = vld [vmem:[%s7306_s3 + $0x78] sm:$0xf0]  ;;  %v4166_v62 = vor.u32 %v4657_v35, %v4163_v6  ;;  %v4078_v27 = vor.u32 %v4635_v51, %v4075_v14  ;;  %v4219_v35 = vld [vmem:[%s7306_s3 + $0x148] sm:$0xf0]  ;;  %v4663_v14 = vld [vmem:[%s7306_s3 + $0x104] sm:$0xf] }
 0x136   :  { %2712 = vmatpush.bf16.msra.mxu0 %v4082_v0  ;;  %v4122_v0 = vor.u32 %v4648_v47, %v4121_v33  ;;  %v4118_v22 = vor.u32 %v4645_v19, %v4115_v34  ;;  %v4675_v33 = vld [vmem:[%s7306_s3 + $0x164] sm:$0xf]  ;;  %v4235_v47 = vld [vmem:[%s7306_s3 + $0x168] sm:$0xf0]  ;;  %v4158_v34 = vor.u32 %v4655_v5, %v4155_v38  ;;  %v4305_v5 = vld [vmem:[%s7306_s3 + $0x1f0] sm:$0xf] }
 0x139   :  { %2725 = vmatpush.bf16.msra.mxu1 %v4146_v43  ;;  %2738 = vmatpush.bf16.msra.mxu2 %v4210_v60  ;;  %v4182_v43 = vor.u32 %v4661_v31, %v4179_v52  ;;  %v4653_v31 = vld [vmem:[%s7306_s3 + $0xb4] sm:$0xf]  ;;  %v4147_v52 = vld [vmem:[%s7306_s3 + $0xb8] sm:$0xf0]  ;;  %v4238_v60 = vor.u32 %v4675_v33, %v4235_v47  ;;  %v4667_v33 = vld [vmem:[%s7306_s3 + $0x124] sm:$0xf] }
 0x13a   :  { %2713 = vmatpush.bf16.msra.mxu0 %v4074_v42  ;;  %v4193_v42 = vld [vmem:[%s7306_s3 + $0x110] sm:$0xf]  ;;  %v4203_v47 = vld [vmem:[%s7306_s3 + $0x128] sm:$0xf0] }
 0x13b   :  { %v4194_v36 = vor.u32 %v4666_v9, %v4193_v42  ;;  %v4067_v42 = vld [vmem:[%s7306_s3 + $0x18] sm:$0xf0]  ;;  %v4649_v9 = vld [vmem:[%s7306_s3 + $0x94] sm:$0xf] }
 0x13d   :  { %2726 = vmatpush.bf16.msra.mxu1 %v4138_v23  ;;  %v4099_v23 = vld [vmem:[%s7306_s3 + $0x58] sm:$0xf0]  ;;  %2739 = vmatpush.bf16.msra.mxu2 %v4202_v54 }
 0x13e   :  { %2714 = vmatpush.bf16.msra.mxu0 %v4066_v61  ;;  %v4102_v30 = vor.u32 %v4641_v21, %v4099_v23  ;;  %v4091_v61 = vld [vmem:[%s7306_s3 + $0x48] sm:$0xf0]  ;;  %v4671_v23 = vld [vmem:[%s7306_s3 + $0x144] sm:$0xf] }
 0x13f   :  { %v4094_v19 = vor.u32 %v4639_v59, %v4091_v61  ;;  %v4222_v6 = vor.u32 %v4671_v23, %v4219_v35  ;;  %v4647_v59 = vld [vmem:[%s7306_s3 + $0x84] sm:$0xf]  ;;  %v4123_v61 = vld [vmem:[%s7306_s3 + $0x88] sm:$0xf0]  ;;  %v4273_v35 = vld [vmem:[%s7306_s3 + $0x1b0] sm:$0xf] }
 0x141   :  { %2727 = vmatpush.bf16.msra.mxu1 %v4130_v18  ;;  %2740 = vmatpush.bf16.msra.mxu2 %v4194_v36  ;;  %v4246_v18 = vor.u32 %v4677_v26, %v4243_v11  ;;  %v556_v36 = vperm.slane %v6414_v12, 2  ;;  %v4211_v26 = vld [vmem:[%s7306_s3 + $0x138] sm:$0xf0]  ;;  %v4059_v12 = vld [vmem:[%s7306_s3 + $0x8] sm:$0xf0] }
 0x142   :  { %2715 = vmatpush.bf16.msra.mxu0 %v4058_v56  ;;  %v4150_v56 = vor.u32 %v4653_v31, %v4147_v52  ;;  %v4126_v31 = vor.u32 %v4647_v59, %v4123_v61  ;;  %v4206_v52 = vor.u32 %v4667_v33, %v4203_v47  ;;  %v4257_v61 = vld [vmem:[%s7306_s3 + $0x190] sm:$0xf]  ;;  %v4249_v33 = vld [vmem:[%s7306_s3 + $0x180] sm:$0xf]  ;;  %v4680_v47 = vld [vmem:[%s7306_s3 + $0x184] sm:$0xf0] }
 0x144   :  { %v2115_v37 = vpop.f32.mrf.mxu0 }
 0x145   :  { %2728 = vmatpush.bf16.msra.mxu1 %v4122_v0  ;;  %2716 = vmatmul.bf16.vlgmr.msra.gmra.mxu0 %v6977_v24  ;;  %v4651_v0 = vld [vmem:[%s7306_s3 + $0xa4] sm:$0xf]  ;;  %v2116_v38 = vadd.f32 %v2115_v37, %v556_v36  ;;  %v4686_v36 = vld [vmem:[%s7306_s3 + $0x1b4] sm:$0xf0] }
 0x146   :  { %2760 = vmatpush.bf16.msrb.mxu0 %v4118_v22  ;;  %2741 = vmatpush.bf16.msra.mxu2 %v4186_v40  ;;  %v4142_v54 = vor.u32 %v4651_v0, %v4139_v13  ;;  %v4214_v40 = vor.u32 %v4669_v15, %v4211_v26  ;;  %v4187_v0 = vld [vmem:[%s7306_s3 + $0x108] sm:$0xf0]  ;;  %v4274_v15 = vor.u32 %v4686_v36, %v4273_v35  ;;  %v4681_v36 = vld [vmem:[%s7306_s3 + $0x194] sm:$0xf] }
 0x147   :  { %v2128_v22 = vpop.f32.mrf.mxu1 }
 0x148   :  { %2729 = vmatmul.bf16.vlgmr.msra.gmra.mxu1 %v6975_v50  ;;  %v2129_v37 = vadd.f32 %v2128_v22, %v2116_v38  ;;  %v4190_v22 = vor.u32 %v4663_v14, %v4187_v0  ;;  %v4689_v0 = vld [vmem:[%s7306_s3 + $0x1d4] sm:$0xf] }
 0x149   :  { %2773 = vmatpush.bf16.msrb.mxu1 %v4182_v43  ;;  %v4673_v43 = vld [vmem:[%s7306_s3 + $0x154] sm:$0xf] }
 0x14a   :  { %2761 = vmatpush.bf16.msrb.mxu0 %v4110_v57  ;;  %2786 = vmatpush.bf16.msrb.mxu2 %v4246_v18  ;;  %v2141_v41 = vpop.f32.mrf.mxu2  ;;  %v4230_v3 = vor.u32 %v4673_v43, %v4227_v25  ;;  %v4633_v57 = vld [vmem:[%s7306_s3 + $0x14] sm:$0xf]  ;;  %v4297_v43 = vld [vmem:[%s7306_s3 + $0x1e0] sm:$0xf]  ;;  %v4289_v25 = vld [vmem:[%s7306_s3 + $0x1d0] sm:$0xf] }
 0x14b   :  { %v2154_v8 = vpop.f32.mrf.mxu3  ;;  %v4070_v7 = vor.u32 %v4633_v57, %v4067_v42  ;;  %v2142_v51 = vadd.f32 %v2141_v41, %v2129_v37  ;;  %v4281_v57 = vld [vmem:[%s7306_s3 + $0x1c0] sm:$0xf]  ;;  %v4688_v42 = vld [vmem:[%s7306_s3 + $0x1c4] sm:$0xf0] }
 0x14c   :  { %v2117_v21 = vpop.f32.mrf.mxu0 }
 0x14d   :  { %2774 = vmatpush.bf16.msrb.mxu1 %v4174_v17  ;;  %v4131_v17 = vld [vmem:[%s7306_s3 + $0x98] sm:$0xf0]  ;;  %v2155_v13 = vadd.f32 %v2154_v8, %v2142_v51 }
 0x14e   :  { %2762 = vmatpush.bf16.msrb.mxu0 %v4102_v30  ;;  %2787 = vmatpush.bf16.msrb.mxu2 %v4238_v60  ;;  %v4134_v11 = vor.u32 %v4649_v9, %v4131_v17  ;;  %v4631_v30 = vld [vmem:[%s7306_s3 + $0x4] sm:$0xf]  ;;  %v4665_v60 = vld [vmem:[%s7306_s3 + $0x114] sm:$0xf]  ;;  %v4282_v17 = vor.u32 %v4688_v42, %v4281_v57 }
 0x151   :  { %2775 = vmatpush.bf16.msrb.mxu1 %v4166_v62  ;;  %v2130_v62 = vpop.f32.mrf.mxu1 }
 0x152   :  { %2763 = vmatpush.bf16.msrb.mxu0 %v4094_v19  ;;  %2788 = vmatpush.bf16.msrb.mxu2 %v4230_v3  ;;  %v2143_v18 = vpop.f32.mrf.mxu2  ;;  %v4694_v19 = vld [vmem:[%s7306_s3 + $0x1f4] sm:$0xf0] }
 0x153   :  { %v2156_v48 = vpop.f32.mrf.mxu3  ;;  %v4306_v45 = vor.u32 %v4694_v19, %v4305_v5  ;;  %v4693_v19 = vld [vmem:[%s7306_s3 + $0x1f4] sm:$0xf] }
 0x154   :  { %v4250_v48 = vor.u32 %v4680_v47, %v4249_v33 }
 0x155   :  { %2776 = vmatpush.bf16.msrb.mxu1 %v4158_v34  ;;  %v4062_v34 = vor.u32 %v4631_v30, %v4059_v12  ;;  %2747 = vmatpush.bf16.msra.mxu3 %v4306_v45  ;;  %v4265_v30 = vld [vmem:[%s7306_s3 + $0x1a0] sm:$0xf]  ;;  %v4684_v12 = vld [vmem:[%s7306_s3 + $0x1a4] sm:$0xf0] }
 0x156   :  { %2764 = vmatpush.bf16.msrb.mxu0 %v4086_v10  ;;  %2789 = vmatpush.bf16.msrb.mxu2 %v4222_v6  ;;  %v4195_v10 = vld [vmem:[%s7306_s3 + $0x118] sm:$0xf0]  ;;  %v4266_v59 = vor.u32 %v4684_v12, %v4265_v30 }
 0x159   :  { %2777 = vmatpush.bf16.msrb.mxu1 %v4150_v56  ;;  %v4198_v56 = vor.u32 %v4665_v60, %v4195_v10 }
 0x15a   :  { %2765 = vmatpush.bf16.msrb.mxu0 %v4078_v27  ;;  %2790 = vmatpush.bf16.msrb.mxu2 %v4214_v40  ;;  %v4682_v40 = vld [vmem:[%s7306_s3 + $0x194] sm:$0xf0] }
 0x15b   :  { %v4258_v18 = vor.u32 %v4682_v40, %v4257_v61 }
 0x15d   :  { %2778 = vmatpush.bf16.msrb.mxu1 %v4142_v54 }
 0x15e   :  { %2766 = vmatpush.bf16.msrb.mxu0 %v4070_v7  ;;  %2791 = vmatpush.bf16.msrb.mxu2 %v4206_v52  ;;  %v4299_v52 = vld [vmem:[%s7306_s3 + $0x1e8] sm:$0xf0] }
 0x161   :  { %2779 = vmatpush.bf16.msrb.mxu1 %v4134_v11 }
 0x162   :  { %2767 = vmatpush.bf16.msrb.mxu0 %v4062_v34  ;;  %2792 = vmatpush.bf16.msrb.mxu2 %v4198_v56  ;;  %v4307_v34 = vld [vmem:[%s7306_s3 + $0x1f8] sm:$0xf0] }
 0x163   :  { %v4310_v45 = vor.u32 %v4693_v19, %v4307_v34 }
 0x164   :  { %v2167_v3 = vpop.f32.mrf.mxu0 }
 0x165   :  { %2780 = vmatpush.bf16.msrb.mxu1 %v4126_v31  ;;  %2768 = vmatmul.bf16.vlgmr.msrb.gmra.mxu0 %v6977_v24  ;;  %v4692_v24 = vld [vmem:[%s7306_s3 + $0x1e4] sm:$0xf0]  ;;  %v2168_v27 = vadd.f32 %v2167_v3, %v2155_v13  ;;  %v4691_v31 = vld [vmem:[%s7306_s3 + $0x1e4] sm:$0xf] }
 0x166   :  { %v4298_v41 = vor.u32 %v4692_v24, %v4297_v43  ;;  %2793 = vmatpush.bf16.msrb.mxu2 %v4190_v22  ;;  %v4302_v60 = vor.u32 %v4691_v31, %v4299_v52  ;;  %v4291_v22 = vld [vmem:[%s7306_s3 + $0x1d8] sm:$0xf0]  ;;  %v4687_v13 = vld [vmem:[%s7306_s3 + $0x1c4] sm:$0xf]  ;;  %v2382_v31 = vld [vmem:[%s7307_s4] sm:$0x3] }
 0x167   :  { %v2180_v54 = vpop.f32.mrf.mxu1  ;;  %v4294_v24 = vor.u32 %v4689_v0, %v4291_v22  ;;  %v2384_v52 = vperm.slane %v2382_v31, 0  ;;  %v2385_v0 = vperm.slane %v2382_v31, 1 }
 0x168   :  { %2781 = vmatmul.bf16.vlgmr.msrb.gmra.mxu1 %v6975_v50  ;;  %v4690_v50 = vld [vmem:[%s7306_s3 + $0x1d4] sm:$0xf0]  ;;  %2748 = vmatpush.bf16.msra.mxu3 %v4298_v41  ;;  %v2181_v9 = vadd.f32 %v2180_v54, %v2168_v27  ;;  %v4685_v27 = vld [vmem:[%s7306_s3 + $0x1b4] sm:$0xf] }
 0x169   :  { %v4290_v8 = vor.u32 %v4690_v50, %v4289_v25  ;;  %v4283_v25 = vld [vmem:[%s7306_s3 + $0x1c8] sm:$0xf0]  ;;  %v4721_v50 = vld [vmem:[%s7305_s2] sm:$0xf] }
 0x16a   :  { %v2193_v21 = vpop.f32.mrf.mxu2  ;;  %v4286_v41 = vor.u32 %v4687_v13, %v4283_v25  ;;  %v557_v3 = vperm.slane %v4721_v50, 3  ;;  %v4702_v50 = vld [vmem:[%s7308_s5 + $0x38] sm:$0xff] }
 0x16b   :  { %v2206_v23 = vpop.f32.mrf.mxu3  ;;  %v2194_v6 = vadd.f32 %v2193_v21, %v2181_v9  ;;  %v4267_v21 = vld [vmem:[%s7306_s3 + $0x1a8] sm:$0xf0]  ;;  %2948 = vmatpush.bf16.msra.mxu0 %v4702_v50  ;;  %v229_v50 = vrot.slane %v5563_v4, 6 }
 0x16c   :  { %2749 = vmatpush.bf16.msra.mxu3 %v4290_v8  ;;  %v2169_v7 = vpop.f32.mrf.mxu0  ;;  %v4275_v8 = vld [vmem:[%s7306_s3 + $0x1b8] sm:$0xf0] }
 0x16d   :  { %v2207_v26 = vadd.f32 %v2206_v23, %v2194_v6  ;;  %v4278_v42 = vor.u32 %v4685_v27, %v4275_v8  ;;  %v4259_v6 = vld [vmem:[%s7306_s3 + $0x198] sm:$0xf0]  ;;  %v4701_v27 = vld [vmem:[%s7308_s5 + $0x30] sm:$0xff] }
 0x16e   :  { %v4262_v7 = vor.u32 %v4681_v36, %v4259_v6  ;;  %v4709_v8 = vld [vmem:[%s7308_s5 + $0x70] sm:$0xff]  ;;  %v4696_v36 = vld [vmem:[%s7308_s5 + $0x8] sm:$0xff] }
 0x16f   :  { %v2182_v11 = vpop.f32.mrf.mxu1  ;;  %v2316_v62 = vpack.c.bf16 %v2207_v26, %v2207_v26  ;;  %v4679_v26 = vld [vmem:[%s7306_s3 + $0x184] sm:$0xf]  ;;  %2949 = vmatpush.bf16.msra.mxu0 %v4701_v27  ;;  %v4708_v6 = vld [vmem:[%s7308_s5 + $0x68] sm:$0xff]  ;;  %v237_v27 = vrot.slane %v5432_v58, 2 }
 0x170   :  { %2750 = vmatpush.bf16.msra.mxu3 %v4282_v17  ;;  %v4683_v17 = vld [vmem:[%s7306_s3 + $0x1a4] sm:$0xf]  ;;  %v4251_v11 = vld [vmem:[%s7306_s3 + $0x188] sm:$0xf0] }
 0x171   :  { %2742 = vmatmul.bf16.vlgmr.msra.gmra.mxu2 %v2316_v62  ;;  %v4270_v23 = vor.u32 %v4683_v17, %v4267_v21  ;;  %v4254_v30 = vor.u32 %v4679_v26, %v4251_v11  ;;  %v4697_v21 = vld [vmem:[%s7308_s5 + $0x10] sm:$0xff]  ;;  %v4706_v26 = vld [vmem:[%s7308_s5 + $0x58] sm:$0xff] }
 0x172   :  { %v2195_v5 = vpop.f32.mrf.mxu2  ;;  %v4705_v11 = vld [vmem:[%s7308_s5 + $0x50] sm:$0xff] }
 0x173   :  { %v2208_v38 = vpop.f32.mrf.mxu3 }
 0x174   :  { %2751 = vmatpush.bf16.msra.mxu3 %v4274_v15 }
 0x178   :  { %2752 = vmatpush.bf16.msra.mxu3 %v4266_v59 }
 0x17c   :  { %2753 = vmatpush.bf16.msra.mxu3 %v4258_v18 }
 0x180   :  { %2754 = vmatpush.bf16.msra.mxu3 %v4250_v48 }
 0x181   :  { %2794 = vmatmul.bf16.vlgmr.msrb.gmra.mxu2 %v2316_v62 }
 0x184   :  { %2799 = vmatpush.bf16.msrb.mxu3 %v4310_v45  ;;  %v2219_v37 = vpop.f32.mrf.mxu0 }
 0x185   :  { %v2220_v9 = vadd.f32 %v2219_v37, %v557_v3  ;;  %v4710_v3 = vld [vmem:[%s7308_s5 + $0x78] sm:$0xff] }
 0x186   :  { %2961 = vmatpush.bf16.msra.mxu1 %v4710_v3  ;;  %v232_v3 = vrot.slane %v5736_v53, 6 }
 0x187   :  { %v2232_v10 = vpop.f32.mrf.mxu1 }
 0x188   :  { %2800 = vmatpush.bf16.msrb.mxu3 %v4302_v60  ;;  %v2233_v35 = vadd.f32 %v2232_v10, %v2220_v9  ;;  %v4698_v9 = vld [vmem:[%s7308_s5 + $0x18] sm:$0xff]  ;;  %v247_v58 = vsel %vm241_vm2, %v5636_v63, %v232_v3 }
 0x18a   :  { %v2245_v56 = vpop.f32.mrf.mxu2  ;;  %2962 = vmatpush.bf16.msra.mxu1 %v4709_v8  ;;  %v235_v8 = vrot.slane %v5590_v46, 6 }
 0x18b   :  { %v2258_v51 = vpop.f32.mrf.mxu3  ;;  %v2246_v15 = vadd.f32 %v2245_v56, %v2233_v35 }
 0x18c   :  { %v2221_v14 = vpop.f32.mrf.mxu0  ;;  %2801 = vmatpush.bf16.msrb.mxu3 %v4294_v24 }
 0x18d   :  { %v2259_v12 = vadd.f32 %v2258_v51, %v2246_v15  ;;  %v4707_v15 = vld [vmem:[%s7308_s5 + $0x60] sm:$0xff] }
 0x18e   :  { %2963 = vmatpush.bf16.msra.mxu1 %v4708_v6 }
 0x18f   :  { %v2234_v43 = vpop.f32.mrf.mxu1 }
 0x190   :  { %2802 = vmatpush.bf16.msrb.mxu3 %v4286_v41 }
 0x192   :  { %v2247_v54 = vpop.f32.mrf.mxu2  ;;  %2964 = vmatpush.bf16.msra.mxu1 %v4707_v15 }
 0x193   :  { %v2260_v57 = vpop.f32.mrf.mxu3  ;;  %v4700_v54 = vld [vmem:[%s7308_s5 + $0x28] sm:$0xff] }
 0x194   :  { %2803 = vmatpush.bf16.msrb.mxu3 %v4278_v42  ;;  %2950 = vmatpush.bf16.msra.mxu0 %v4700_v54  ;;  %v4699_v42 = vld [vmem:[%s7308_s5 + $0x20] sm:$0xff]  ;;  %v233_v54 = vrot.slane %v5612_v2, 4  ;;  %v250_v2 = vsel %vm241_vm2, %v5410_v16, %v235_v8 }
 0x196   :  { %2965 = vmatpush.bf16.msra.mxu1 %v4706_v26 }
 0x198   :  { %2804 = vmatpush.bf16.msrb.mxu3 %v4270_v23  ;;  %2951 = vmatpush.bf16.msra.mxu0 %v4699_v42  ;;  %v238_v42 = vrot.slane %v5769_v39, 6 }
 0x19a   :  { %2966 = vmatpush.bf16.msra.mxu1 %v4705_v11 }
 0x19c   :  { %2805 = vmatpush.bf16.msrb.mxu3 %v4262_v7  ;;  %2952 = vmatpush.bf16.msra.mxu0 %v4698_v9  ;;  %v4695_v7 = vld [vmem:[%s7308_s5] sm:$0xff] }
 0x1a0   :  { %2806 = vmatpush.bf16.msrb.mxu3 %v4254_v30  ;;  %2953 = vmatpush.bf16.msra.mxu0 %v4697_v21  ;;  %v4704_v30 = vld [vmem:[%s7308_s5 + $0x48] sm:$0xff] }
 0x1a1   :  { %2967 = vmatpush.bf16.msra.mxu1 %v4704_v30 }
 0x1a4   :  { %v2271_v62 = vpop.f32.mrf.mxu0  ;;  %2954 = vmatpush.bf16.msra.mxu0 %v4696_v36 }
 0x1a5   :  { %v2284_v59 = vpop.f32.mrf.mxu1  ;;  %v2272_v61 = vadd.f32 %v2271_v62, %v2259_v12  ;;  %v4703_v12 = vld [vmem:[%s7308_s5 + $0x40] sm:$0xff]  ;;  %s4775_s5 = smov [#allocation4]  }
 0x1a6   :  { %2968 = vmatpush.bf16.msra.mxu1 %v4703_v12 }
 0x1a7   :  { %v2285_v40 = vadd.f32 %v2284_v59, %v2272_v61 }
 0x1a8   :  { %2955 = vmatpush.bf16.msra.mxu0 %v4695_v7 }
 0x1aa   :  { %v2297_v5 = vpop.f32.mrf.mxu2 }
 0x1ab   :  { %v2298_v38 = vadd.f32 %v2297_v5, %v2285_v40  ;;  %v2310_v18 = vpop.f32.mrf.mxu3 }
 0x1ac   :  { %v2273_v33 = vpop.f32.mrf.mxu0 }
 0x1ad   :  { %v2286_v47 = vpop.f32.mrf.mxu1  ;;  %v2311_v19 = vadd.f32 %v2310_v18, %v2298_v38 }
 0x1af   :  { %v2317_v34 = vpack.c.bf16 %v2311_v19, %v2311_v19 }
 0x1b1   :  { %2755 = vmatmul.bf16.vlgmr.msra.gmra.mxu3 %v2317_v34 }
 0x1b2   :  { %v2299_v48 = vpop.f32.mrf.mxu2 }
 0x1b3   :  { %v2312_v45 = vpop.f32.mrf.mxu3 }
 0x1c1   :  { %2807 = vmatmul.bf16.vlgmr.msrb.gmra.mxu3 %v2317_v34 }
 0x1c2   :  { %v2717_v37 = vpop.f32.mrf.mxu0 }
 0x1c3   :  { %v2718_v60 = vadd.f32 %v2717_v37, %v2384_v52  ;;  %v4714_v52 = vld [vmem:[%s7309_s6] ss:$0 sm:$0xff]  ;;  %s3015_s6 = sshll.u32 %s4775_s5, 4  ;;  %s3016_s6 = int_to_ptr.vmem [resolvable:$true] %s3015_s6 }
 0x1c5   :  { %v2730_v10 = vpop.f32.mrf.mxu1 }
 0x1c6   :  { %v2731_v56 = vadd.f32 %v2730_v10, %v2718_v60 }
 0x1ca   :  { %v2719_v51 = vpop.f32.mrf.mxu0 }
 0x1cd   :  { %v2732_v14 = vpop.f32.mrf.mxu1 }
 0x1e2   :  { %v2769_v22 = vpop.f32.mrf.mxu0 }
 0x1e3   :  { %v2770_v13 = vadd.f32 %v2769_v22, %v2385_v0 }
 0x1e5   :  { %v2782_v43 = vpop.f32.mrf.mxu1 }
 0x1e6   :  { %v2783_v24 = vadd.f32 %v2782_v43, %v2770_v13 }
 0x1ea   :  { %v2771_v25 = vpop.f32.mrf.mxu0 }
 0x1eb   :  { %v236_v25 = vrot.slane %v5401_v44, 4  ;;  %v240_v44 = vrot.slane %v5686_v28, 2 }
 0x1ed   :  { %v2784_v41 = vpop.f32.mrf.mxu1 }
 0x1ee   :  { %v231_v41 = vrot.slane %v5416_v55, 2  ;;  %v242_v55 = vsel %vm241_vm2, %v5407_v32, %v229_v50 }
 0x1f4   :  { %v2743_v57 = vpop.f32.mrf.mxu2 }
 0x1f5   :  { %v2744_v62 = vadd.f32 %v2743_v57, %v2731_v56  ;;  %v234_v57 = vrot.slane %v5667_v1, 2  ;;  %v251_v1 = vsel %vm243_vm3, %v236_v25, %v237_v27 }
 0x1f6   :  { %v252_v9 = vsel %vm245_vm4, %v250_v2, %v251_v1 }
 0x1f7   :  { %v248_v46 = vsel %vm243_vm3, %v233_v54, %v234_v57 }
 0x1f8   :  { %v249_v39 = vsel %vm245_vm4, %v247_v58, %v248_v46 }
 0x1fc   :  { %v2745_v17 = vpop.f32.mrf.mxu2 }
 0x1fd   :  { %v260_v17 = vrot.slane %v252_v9, 7 }
 0x204   :  { %v2795_v23 = vpop.f32.mrf.mxu2 }
 0x205   :  { %v2796_v18 = vadd.f32 %v2795_v23, %v2783_v24  ;;  %v230_v24 = vrot.slane %v5395_v49, 4  ;;  %v239_v49 = vrot.slane %v5622_v29, 4  ;;  %v253_v29 = vsel %vm241_vm2, %v5645_v20, %v238_v42 }
 0x207   :  { %v244_v4 = vsel %vm243_vm3, %v230_v24, %v231_v41  ;;  %v254_v28 = vsel %vm243_vm3, %v239_v49, %v240_v44 }
 0x208   :  { %v246_v53 = vsel %vm245_vm4, %v242_v55, %v244_v4  ;;  %v255_v32 = vsel %vm245_vm4, %v253_v29, %v254_v28 }
 0x209   :  { %v262_v21 = vsel %vm261_vm1, %v260_v17, %v246_v53  ;;  %v271_v63 = vrot.slane %v255_v32, 7 }
 0x20a   :  { %v264_v23 = vsel %vm263_vm5, %v260_v17, %v262_v21 }
 0x20b   :  { %v266_v16 = vsel %vm265_vm6, %v260_v17, %v264_v23 }
 0x20c   :  { %v2797_v35 = vpop.f32.mrf.mxu2  ;;  %v268_v20 = vsel %vm267_vm7, %v260_v17, %v266_v16 }
 0x20d   :  { %v272_v35 = vsel %vm261_vm1, %v271_v63, %v249_v39  ;;  %278 = vst [vmem:[#allocation4] sm:$0xff] %v268_v20 }
 0x20e   :  { %v273_v36 = vsel %vm263_vm5, %v271_v63, %v272_v35 }
 0x20f   :  { %v274_v6 = vsel %vm265_vm6, %v271_v63, %v273_v36 }
 0x210   :  { %v275_v7 = vsel %vm267_vm7, %v271_v63, %v274_v6 }
 0x211   :  { %279 = vst [vmem:[#allocation4 + $0x8] sm:$0xff] %v275_v7 }
 0x212   :  { %3020 = dma.vmem_to_hbm [thread:$0]  %s3016_s6, 256, %s3018_s21, [#allocation5]  }
 0x234   :  { %v2756_v59 = vpop.f32.mrf.mxu3 }
 0x235   :  { %v2757_v61 = vadd.f32 %v2756_v59, %v2744_v62 }
 0x237   :  { %v2812_v40 = vmax.f32 %v2757_v61, 0.0 }
 0x239   :  { %v2814_v5 = vpack.c.bf16 %v2812_v40, %v2812_v40 }
 0x23b   :  { %2956 = vmatmul.bf16.vlgmr.msra.gmra.mxu0 %v2814_v5 }
 0x23c   :  { %v2758_v38 = vpop.f32.mrf.mxu3 }
 0x244   :  { %v2808_v33 = vpop.f32.mrf.mxu3 }
 0x245   :  { %v2809_v47 = vadd.f32 %v2808_v33, %v2796_v18 }
 0x247   :  { %v2813_v19 = vmax.f32 %v2809_v47, 0.0 }
 0x249   :  { %v2815_v34 = vpack.c.bf16 %v2813_v19, %v2813_v19 }
 0x24b   :  { %2969 = vmatmul.bf16.vlgmr.msra.gmra.mxu1 %v2815_v34 }
 0x24c   :  { %v2810_v48 = vpop.f32.mrf.mxu3 }
 0x2b8   :  { %v2957_v45 = vpop.f32.mrf.mxu0 }
 0x2b9   :  { %v2958_v37 = vadd.f32 %v4714_v52, %v2957_v45 }
 0x2c0   :  { %v2959_v31 = vpop.f32.mrf.mxu0 }
 0x2c8   :  { %v2970_v60 = vpop.f32.mrf.mxu1 }
 0x2c9   :  { %v2971_v10 = vadd.f32 %v2970_v60, %v2958_v37 }
 0x2cb   :  { %v2974_v56 = vsel %vm241_vm2, %v2971_v10, -inf }
 0x2cc   :  { %2975 = vmax.xlane.f32.xlu0 %v2974_v56 }
 0x2d0   :  { %v2972_v51 = vpop.f32.mrf.mxu1 }
 0x33f   :  { %v2976_v14 = vpop.xlane.xlu0 %2975 }
 0x340   :  { %v2977_v0 = vsub.f32 %v2971_v10, %v2976_v14 }
 0x342   :  { %v2978_v22 = vmul.f32 1.442695, %v2977_v0 }
 0x344   :  { %4717 = vpow2.f32 %v2978_v22 }
 0x34a   :  { %v7270_v13 = vpop.eup %4717 }
 0x34b   :  { %v2980_v43 = vsel %vm241_vm2, %v7270_v13, 0.0 }
 0x34c   :  { %2981 = vadd.xlane.f32.xlu0 %v2980_v43 }
 0x3bf   :  { %v2982_v15 = vpop.xlane.xlu0 %2981 }
 0x3c0   :  { %4719 = vrcp.f32 %v2982_v15  ;;  %v2994_v12 = vand.u32 2147483648, %v2982_v15  ;;  %v2992_v59 = vand.u32 2147483647, %v2982_v15  ;;  %vm2988_vm9 = vweird.f32 %v2982_v15 }
 0x3c2   :  { %v2995_v40 = vor.u32 1.1754944e-38, %v2994_v12  ;;  %vm2993_vm11 = vcmp.eq.f32.partialorder %v2992_v59, 8.507059e+37 }
 0x3c6   :  { %v4720_v26 = vpop.eup %4719 }
 0x3c7   :  { %v2984_v11 = vmul.f32 %v4720_v26, %v2982_v15  ;;  %vm2989_vm8 = vweird.f32 %v4720_v26 }
 0x3c8   :  { %vm2990_vm10 = vmor %vm2988_vm9, %vm2989_vm8 }
 0x3c9   :  { %v2985_v30 = vsub.f32 1.0, %v2984_v11 }
 0x3cb   :  { %v2986_v62 = vmul.f32 %v4720_v26, %v2985_v30 }
 0x3cd   :  { %v2987_v61 = vadd.f32 %v4720_v26, %v2986_v62 }
 0x3cf   :  { %v2991_v5 = vsel %vm2990_vm10, %v4720_v26, %v2987_v61 }
 0x3d0   :  { %v2996_v38 = vsel %vm2993_vm11, %v2995_v40, %v2991_v5 }
 0x3d1   :  { %v2997_v18 = vmul.f32 %v7270_v13, %v2996_v38 }
 0x3d3   :  { %2998 = vst [vmem:[#allocation2] sm:$0x3] %v2997_v18 }
 0x3d4   :  { %3009 = dma.vmem_to_hbm [thread:$0]  %s3005_s22, 32, %s3007_s0, [#allocation3]  }
 0x3d5   :  { %4770 = dma.done.wait [#allocation3], 32  }
 0x3d6   :  { %4771 = vsyncadd [#allocation3], 4294967264 }
 0x3d7   :  { %4772 = dma.done.wait [#allocation5], 256  }
 0x3d8   :  { %4773 = vsyncadd [#allocation5], 4294967040 }
 0x3d9   :  { %3029 = vsyncpa [#allocation3], 1 }
 0x3da   :  { %3030 = vsyncpa [#allocation5], 1 }

</bundles_post_ra>
